<compile_context>
chip_gen: v5e
topology: v5e:2x2
jax: 0.10.0
libtpu: 0.0.40
codegen_flags: <defaults>
</compile_context>

<pallas_src>
import jax
import jax.numpy as jnp
from jax.experimental import pallas as pl
from jax.experimental.pallas import tpu as pltpu


def sru2_last_kernel(x_ref, w_ref, b_ref, out_ref, h1_ref):
    """Fused 2-layer SRU; writes only the last timestep of the top layer.

    x_ref : (T, B, D)   f32   input sequence (time-first)
    w_ref : (2, D, 3H)  f32   per-layer projection weights
    b_ref : (2, 2, 1, H)f32   per-layer [forget, reset] biases
    out_ref: (1, B, H)  f32   out[-1:] of the top layer
    h1_ref : (T, B, H)  f32   VMEM scratch for the layer-0 hidden sequence
    """
    x = x_ref[...]
    b = b_ref[...]
    T, B, D = x.shape
    H = w_ref.shape[2] // 3

    # ---------------- Layer 0 ----------------
    # Single 2-D MXU matmul for all timesteps.
    u0 = jnp.dot(x.reshape(T * B, D), w_ref[0],
                 preferred_element_type=jnp.float32).reshape(T, B, 3 * H)
    z0 = u0[..., 0:H]
    f0 = jax.nn.sigmoid(u0[..., H:2 * H] + b[0, 0])
    r0 = jax.nn.sigmoid(u0[..., 2 * H:3 * H] + b[0, 1])
    # Hoist time-invariant products off the serial recurrence.
    fz0 = (1.0 - f0) * z0
    rx0 = (1.0 - r0) * x          # highway with x_t (requires D == H)

    # Serial recurrence over time.  T is a small static constant (8), so a
    # static Python loop (constant slice indices) is the cheapest form here;
    # switch to lax.fori_loop for large T.
    c = jnp.zeros((B, H), jnp.float32)
    for t in range(T):
        c = f0[t] * c + fz0[t]
        h1_ref[t] = r0[t] * jnp.tanh(c) + rx0[t]

    # ---------------- Layer 1 ----------------
    h1 = h1_ref[...]
    u1 = jnp.dot(h1.reshape(T * B, H), w_ref[1],
                 preferred_element_type=jnp.float32).reshape(T, B, 3 * H)
    z1 = u1[..., 0:H]
    f1 = jax.nn.sigmoid(u1[..., H:2 * H] + b[1, 0])
    r1 = jax.nn.sigmoid(u1[..., 2 * H:3 * H] + b[1, 1])
    fz1 = (1.0 - f1) * z1

    # Only the cell-state recurrence runs over all t; h is needed at t = T-1.
    c = jnp.zeros((B, H), jnp.float32)
    for t in range(T):
        c = f1[t] * c + fz1[t]
    out_ref[0] = r1[T - 1] * jnp.tanh(c) + (1.0 - r1[T - 1]) * h1[T - 1]


def model_forward(x, w_stacked, b_stacked):
    """Model.forward: out, _ = SRU(x); return out[-1:].  Single fused kernel."""
    T, B, D = x.shape
    H = w_stacked.shape[2] // 3
    assert D == H, "projection-free SRU highway path requires input == hidden"

    vmem = pl.BlockSpec(memory_space=pltpu.MemorySpace.VMEM)
    flops = 2 * 2 * (T * B) * D * (3 * H)            # two projection matmuls
    transc = 2 * 3 * T * B * H                       # 2 sigmoids + 1 tanh / layer
    bytes_acc = 4 * (x.size + w_stacked.size + b_stacked.size + B * H)

    return pl.pallas_call(
        sru2_last_kernel,
        out_shape=jax.ShapeDtypeStruct((1, B, H), jnp.float32),
        in_specs=[vmem, vmem, vmem],
        out_specs=vmem,
        scratch_shapes=[pltpu.VMEM((T, B, H), jnp.float32)],
        cost_estimate=pl.CostEstimate(
            flops=flops, transcendentals=transc, bytes_accessed=bytes_acc),
    )(x, w_stacked, b_stacked)


def init_sru_params(key, input_size, hidden_size, num_layers):
    """Pack all layers' weights/biases into two arrays for a 3-input kernel."""
    ws, bs = [], []
    d_in = input_size
    for _ in range(num_layers):
        key, kw, kf, kr = jax.random.split(key, 4)
        scale = 1.0 / jnp.sqrt(jnp.float32(d_in))
        w = jax.random.normal(kw, (d_in, 3 * hidden_size), jnp.float32) * scale
        b_f = jax.random.normal(kf, (1, hidden_size), jnp.float32) * 0.1
        b_r = jax.random.normal(kr, (1, hidden_size), jnp.float32) * 0.1
        ws.append(w)
        bs.append(jnp.stack([b_f, b_r]))             # (2, 1, H)
        d_in = hidden_size
    return jnp.stack(ws), jnp.stack(bs)              # (L, D, 3H), (L, 2, 1, H)


if __name__ == "__main__":
    # Small shapes consistent with the module: seq=8, batch=2,
    # input_size = hidden_size = 32, num_layers = 2.
    T, B, D, H, L = 8, 2, 32, 32, 2

    key = jax.random.PRNGKey(0)
    key, kx = jax.random.split(key)
    x = jax.random.normal(kx, (T, B, D), jnp.float32)
    w_stacked, b_stacked = init_sru_params(key, D, H, L)

    out = jax.jit(model_forward)(x, w_stacked, b_stacked)
    out = jax.block_until_ready(out)

    assert out.shape == (1, B, H), out.shape
    assert out.dtype == jnp.float32
    assert bool(jnp.all(jnp.isfinite(out)))
    print("KERNEL_OK")
</pallas_src>

<mosaic_0001>
module attributes {stable_mosaic.version = 11 : i64} {
  func.func @sru2_last_kernel(%arg0: memref<8x2x32xf32, #tpu.memory_space<vmem>>, %arg1: memref<2x32x96xf32, #tpu.memory_space<vmem>>, %arg2: memref<2x2x1x32xf32, #tpu.memory_space<vmem>>, %arg3: memref<1x2x32xf32, #tpu.memory_space<vmem>>, %arg4: memref<8x2x32xf32, #tpu.memory_space<vmem>>) attributes {dimension_semantics = [], scalar_prefetch = 0 : i64, scratch_operands = 1 : i64, tpu.core_type = #tpu.core_type<tc>} {
    %c0 = arith.constant 0 : index
    %c0_0 = arith.constant 0 : index
    %c0_1 = arith.constant 0 : index
    %0 = vector.load %arg0[%c0, %c0_0, %c0_1] : memref<8x2x32xf32, #tpu.memory_space<vmem>>, vector<8x2x32xf32>
    %c0_2 = arith.constant 0 : index
    %c0_3 = arith.constant 0 : index
    %c0_4 = arith.constant 0 : index
    %c0_5 = arith.constant 0 : index
    %1 = vector.load %arg2[%c0_2, %c0_3, %c0_4, %c0_5] : memref<2x2x1x32xf32, #tpu.memory_space<vmem>>, vector<2x2x1x32xf32>
    %2 = vector.shape_cast %0 : vector<8x2x32xf32> to vector<16x32xf32>
    %c0_6 = arith.constant 0 : index
    %c0_7 = arith.constant 0 : index
    %c0_8 = arith.constant 0 : index
    %3 = vector.load %arg1[%c0_6, %c0_7, %c0_8] : memref<2x32x96xf32, #tpu.memory_space<vmem>>, vector<1x32x96xf32>
    %4 = vector.shape_cast %3 : vector<1x32x96xf32> to vector<32x96xf32>
    %cst = arith.constant dense<0.000000e+00> : vector<16x96xf32>
    %5 = tpu.matmul %2, %4, %cst {dimension_numbers = #tpu.dot_dimension_numbers<[1], [0], [0], [1], [0, 0, 1, 1], [], []>} : vector<16x32xf32>, vector<32x96xf32>, vector<16x96xf32> -> vector<16x96xf32>
    %6 = vector.shape_cast %5 : vector<16x96xf32> to vector<8x2x96xf32>
    %7 = vector.extract_strided_slice %6 {offsets = [0, 0, 0], sizes = [8, 2, 32], strides = [1, 1, 1]} : vector<8x2x96xf32> to vector<8x2x32xf32>
    %8 = vector.extract_strided_slice %6 {offsets = [0, 0, 32], sizes = [8, 2, 32], strides = [1, 1, 1]} : vector<8x2x96xf32> to vector<8x2x32xf32>
    %9 = vector.extract_strided_slice %1 {offsets = [0, 0, 0, 0], sizes = [1, 1, 1, 32], strides = [1, 1, 1, 1]} : vector<2x2x1x32xf32> to vector<1x1x1x32xf32>
    %10 = vector.shape_cast %9 : vector<1x1x1x32xf32> to vector<1x32xf32>
    %11 = vector.shape_cast %10 : vector<1x32xf32> to vector<1x1x32xf32>
    %12 = vector.broadcast %11 : vector<1x1x32xf32> to vector<8x2x32xf32>
    %13 = arith.addf %8, %12 : vector<8x2x32xf32>
    %14 = arith.negf %13 : vector<8x2x32xf32>
    %15 = math.exp %14 : vector<8x2x32xf32>
    %cst_9 = arith.constant 1.000000e+00 : f32
    %16 = vector.broadcast %cst_9 : f32 to vector<8x2x32xf32>
    %17 = arith.addf %16, %15 : vector<8x2x32xf32>
    %18 = arith.divf %16, %17 : vector<8x2x32xf32>
    %19 = vector.extract_strided_slice %6 {offsets = [0, 0, 64], sizes = [8, 2, 32], strides = [1, 1, 1]} : vector<8x2x96xf32> to vector<8x2x32xf32>
    %20 = vector.extract_strided_slice %1 {offsets = [0, 1, 0, 0], sizes = [1, 1, 1, 32], strides = [1, 1, 1, 1]} : vector<2x2x1x32xf32> to vector<1x1x1x32xf32>
    %21 = vector.shape_cast %20 : vector<1x1x1x32xf32> to vector<1x32xf32>
    %22 = vector.shape_cast %21 : vector<1x32xf32> to vector<1x1x32xf32>
    %23 = vector.broadcast %22 : vector<1x1x32xf32> to vector<8x2x32xf32>
    %24 = arith.addf %19, %23 : vector<8x2x32xf32>
    %25 = arith.negf %24 : vector<8x2x32xf32>
    %26 = math.exp %25 : vector<8x2x32xf32>
    %cst_10 = arith.constant 1.000000e+00 : f32
    %27 = vector.broadcast %cst_10 : f32 to vector<8x2x32xf32>
    %28 = arith.addf %27, %26 : vector<8x2x32xf32>
    %29 = arith.divf %27, %28 : vector<8x2x32xf32>
    %cst_11 = arith.constant 1.000000e+00 : f32
    %30 = vector.broadcast %cst_11 : f32 to vector<8x2x32xf32>
    %31 = arith.subf %30, %18 : vector<8x2x32xf32>
    %32 = arith.mulf %31, %7 : vector<8x2x32xf32>
    %cst_12 = arith.constant 1.000000e+00 : f32
    %33 = vector.broadcast %cst_12 : f32 to vector<8x2x32xf32>
    %34 = arith.subf %33, %29 : vector<8x2x32xf32>
    %35 = arith.mulf %34, %0 : vector<8x2x32xf32>
    %cst_13 = arith.constant 0.000000e+00 : f32
    %36 = vector.broadcast %cst_13 : f32 to vector<2x32xf32>
    %37 = vector.extract_strided_slice %18 {offsets = [0, 0, 0], sizes = [1, 2, 32], strides = [1, 1, 1]} : vector<8x2x32xf32> to vector<1x2x32xf32>
    %38 = vector.shape_cast %37 : vector<1x2x32xf32> to vector<2x32xf32>
    %39 = arith.mulf %38, %36 : vector<2x32xf32>
    %40 = vector.extract_strided_slice %32 {offsets = [0, 0, 0], sizes = [1, 2, 32], strides = [1, 1, 1]} : vector<8x2x32xf32> to vector<1x2x32xf32>
    %41 = vector.shape_cast %40 : vector<1x2x32xf32> to vector<2x32xf32>
    %42 = arith.addf %39, %41 : vector<2x32xf32>
    %43 = vector.extract_strided_slice %29 {offsets = [0, 0, 0], sizes = [1, 2, 32], strides = [1, 1, 1]} : vector<8x2x32xf32> to vector<1x2x32xf32>
    %44 = vector.shape_cast %43 : vector<1x2x32xf32> to vector<2x32xf32>
    %45 = math.tanh %42 : vector<2x32xf32>
    %46 = arith.mulf %44, %45 : vector<2x32xf32>
    %47 = vector.extract_strided_slice %35 {offsets = [0, 0, 0], sizes = [1, 2, 32], strides = [1, 1, 1]} : vector<8x2x32xf32> to vector<1x2x32xf32>
    %48 = vector.shape_cast %47 : vector<1x2x32xf32> to vector<2x32xf32>
    %49 = arith.addf %46, %48 : vector<2x32xf32>
    %c0_14 = arith.constant 0 : index
    %c0_15 = arith.constant 0 : index
    %c0_16 = arith.constant 0 : index
    %50 = vector.load %arg4[%c0_14, %c0_15, %c0_16] : memref<8x2x32xf32, #tpu.memory_space<vmem>>, vector<1x2x32xf32>
    %51 = vector.shape_cast %50 : vector<1x2x32xf32> to vector<2x32xf32>
    %52 = vector.shape_cast %49 : vector<2x32xf32> to vector<1x2x32xf32>
    tpu.vector_store %arg4[%c0_14, %c0_15, %c0_16], %52 {strides = array<i32>} : memref<8x2x32xf32, #tpu.memory_space<vmem>>, vector<1x2x32xf32>,
    %53 = vector.extract_strided_slice %18 {offsets = [1, 0, 0], sizes = [1, 2, 32], strides = [1, 1, 1]} : vector<8x2x32xf32> to vector<1x2x32xf32>
    %54 = vector.shape_cast %53 : vector<1x2x32xf32> to vector<2x32xf32>
    %55 = arith.mulf %54, %42 : vector<2x32xf32>
    %56 = vector.extract_strided_slice %32 {offsets = [1, 0, 0], sizes = [1, 2, 32], strides = [1, 1, 1]} : vector<8x2x32xf32> to vector<1x2x32xf32>
    %57 = vector.shape_cast %56 : vector<1x2x32xf32> to vector<2x32xf32>
    %58 = arith.addf %55, %57 : vector<2x32xf32>
    %59 = vector.extract_strided_slice %29 {offsets = [1, 0, 0], sizes = [1, 2, 32], strides = [1, 1, 1]} : vector<8x2x32xf32> to vector<1x2x32xf32>
    %60 = vector.shape_cast %59 : vector<1x2x32xf32> to vector<2x32xf32>
    %61 = math.tanh %58 : vector<2x32xf32>
    %62 = arith.mulf %60, %61 : vector<2x32xf32>
    %63 = vector.extract_strided_slice %35 {offsets = [1, 0, 0], sizes = [1, 2, 32], strides = [1, 1, 1]} : vector<8x2x32xf32> to vector<1x2x32xf32>
    %64 = vector.shape_cast %63 : vector<1x2x32xf32> to vector<2x32xf32>
    %65 = arith.addf %62, %64 : vector<2x32xf32>
    %c1 = arith.constant 1 : index
    %c0_17 = arith.constant 0 : index
    %c0_18 = arith.constant 0 : index
    %66 = vector.load %arg4[%c1, %c0_17, %c0_18] : memref<8x2x32xf32, #tpu.memory_space<vmem>>, vector<1x2x32xf32>
    %67 = vector.shape_cast %66 : vector<1x2x32xf32> to vector<2x32xf32>
    %68 = vector.shape_cast %65 : vector<2x32xf32> to vector<1x2x32xf32>
    tpu.vector_store %arg4[%c1, %c0_17, %c0_18], %68 {strides = array<i32>} : memref<8x2x32xf32, #tpu.memory_space<vmem>>, vector<1x2x32xf32>,
    %69 = vector.extract_strided_slice %18 {offsets = [2, 0, 0], sizes = [1, 2, 32], strides = [1, 1, 1]} : vector<8x2x32xf32> to vector<1x2x32xf32>
    %70 = vector.shape_cast %69 : vector<1x2x32xf32> to vector<2x32xf32>
    %71 = arith.mulf %70, %58 : vector<2x32xf32>
    %72 = vector.extract_strided_slice %32 {offsets = [2, 0, 0], sizes = [1, 2, 32], strides = [1, 1, 1]} : vector<8x2x32xf32> to vector<1x2x32xf32>
    %73 = vector.shape_cast %72 : vector<1x2x32xf32> to vector<2x32xf32>
    %74 = arith.addf %71, %73 : vector<2x32xf32>
    %75 = vector.extract_strided_slice %29 {offsets = [2, 0, 0], sizes = [1, 2, 32], strides = [1, 1, 1]} : vector<8x2x32xf32> to vector<1x2x32xf32>
    %76 = vector.shape_cast %75 : vector<1x2x32xf32> to vector<2x32xf32>
    %77 = math.tanh %74 : vector<2x32xf32>
    %78 = arith.mulf %76, %77 : vector<2x32xf32>
    %79 = vector.extract_strided_slice %35 {offsets = [2, 0, 0], sizes = [1, 2, 32], strides = [1, 1, 1]} : vector<8x2x32xf32> to vector<1x2x32xf32>
    %80 = vector.shape_cast %79 : vector<1x2x32xf32> to vector<2x32xf32>
    %81 = arith.addf %78, %80 : vector<2x32xf32>
    %c2 = arith.constant 2 : index
    %c0_19 = arith.constant 0 : index
    %c0_20 = arith.constant 0 : index
    %82 = vector.load %arg4[%c2, %c0_19, %c0_20] : memref<8x2x32xf32, #tpu.memory_space<vmem>>, vector<1x2x32xf32>
    %83 = vector.shape_cast %82 : vector<1x2x32xf32> to vector<2x32xf32>
    %84 = vector.shape_cast %81 : vector<2x32xf32> to vector<1x2x32xf32>
    tpu.vector_store %arg4[%c2, %c0_19, %c0_20], %84 {strides = array<i32>} : memref<8x2x32xf32, #tpu.memory_space<vmem>>, vector<1x2x32xf32>,
    %85 = vector.extract_strided_slice %18 {offsets = [3, 0, 0], sizes = [1, 2, 32], strides = [1, 1, 1]} : vector<8x2x32xf32> to vector<1x2x32xf32>
    %86 = vector.shape_cast %85 : vector<1x2x32xf32> to vector<2x32xf32>
    %87 = arith.mulf %86, %74 : vector<2x32xf32>
    %88 = vector.extract_strided_slice %32 {offsets = [3, 0, 0], sizes = [1, 2, 32], strides = [1, 1, 1]} : vector<8x2x32xf32> to vector<1x2x32xf32>
    %89 = vector.shape_cast %88 : vector<1x2x32xf32> to vector<2x32xf32>
    %90 = arith.addf %87, %89 : vector<2x32xf32>
    %91 = vector.extract_strided_slice %29 {offsets = [3, 0, 0], sizes = [1, 2, 32], strides = [1, 1, 1]} : vector<8x2x32xf32> to vector<1x2x32xf32>
    %92 = vector.shape_cast %91 : vector<1x2x32xf32> to vector<2x32xf32>
    %93 = math.tanh %90 : vector<2x32xf32>
    %94 = arith.mulf %92, %93 : vector<2x32xf32>
    %95 = vector.extract_strided_slice %35 {offsets = [3, 0, 0], sizes = [1, 2, 32], strides = [1, 1, 1]} : vector<8x2x32xf32> to vector<1x2x32xf32>
    %96 = vector.shape_cast %95 : vector<1x2x32xf32> to vector<2x32xf32>
    %97 = arith.addf %94, %96 : vector<2x32xf32>
    %c3 = arith.constant 3 : index
    %c0_21 = arith.constant 0 : index
    %c0_22 = arith.constant 0 : index
    %98 = vector.load %arg4[%c3, %c0_21, %c0_22] : memref<8x2x32xf32, #tpu.memory_space<vmem>>, vector<1x2x32xf32>
    %99 = vector.shape_cast %98 : vector<1x2x32xf32> to vector<2x32xf32>
    %100 = vector.shape_cast %97 : vector<2x32xf32> to vector<1x2x32xf32>
    tpu.vector_store %arg4[%c3, %c0_21, %c0_22], %100 {strides = array<i32>} : memref<8x2x32xf32, #tpu.memory_space<vmem>>, vector<1x2x32xf32>,
    %101 = vector.extract_strided_slice %18 {offsets = [4, 0, 0], sizes = [1, 2, 32], strides = [1, 1, 1]} : vector<8x2x32xf32> to vector<1x2x32xf32>
    %102 = vector.shape_cast %101 : vector<1x2x32xf32> to vector<2x32xf32>
    %103 = arith.mulf %102, %90 : vector<2x32xf32>
    %104 = vector.extract_strided_slice %32 {offsets = [4, 0, 0], sizes = [1, 2, 32], strides = [1, 1, 1]} : vector<8x2x32xf32> to vector<1x2x32xf32>
    %105 = vector.shape_cast %104 : vector<1x2x32xf32> to vector<2x32xf32>
    %106 = arith.addf %103, %105 : vector<2x32xf32>
    %107 = vector.extract_strided_slice %29 {offsets = [4, 0, 0], sizes = [1, 2, 32], strides = [1, 1, 1]} : vector<8x2x32xf32> to vector<1x2x32xf32>
    %108 = vector.shape_cast %107 : vector<1x2x32xf32> to vector<2x32xf32>
    %109 = math.tanh %106 : vector<2x32xf32>
    %110 = arith.mulf %108, %109 : vector<2x32xf32>
    %111 = vector.extract_strided_slice %35 {offsets = [4, 0, 0], sizes = [1, 2, 32], strides = [1, 1, 1]} : vector<8x2x32xf32> to vector<1x2x32xf32>
    %112 = vector.shape_cast %111 : vector<1x2x32xf32> to vector<2x32xf32>
    %113 = arith.addf %110, %112 : vector<2x32xf32>
    %c4 = arith.constant 4 : index
    %c0_23 = arith.constant 0 : index
    %c0_24 = arith.constant 0 : index
    %114 = vector.load %arg4[%c4, %c0_23, %c0_24] : memref<8x2x32xf32, #tpu.memory_space<vmem>>, vector<1x2x32xf32>
    %115 = vector.shape_cast %114 : vector<1x2x32xf32> to vector<2x32xf32>
    %116 = vector.shape_cast %113 : vector<2x32xf32> to vector<1x2x32xf32>
    tpu.vector_store %arg4[%c4, %c0_23, %c0_24], %116 {strides = array<i32>} : memref<8x2x32xf32, #tpu.memory_space<vmem>>, vector<1x2x32xf32>,
    %117 = vector.extract_strided_slice %18 {offsets = [5, 0, 0], sizes = [1, 2, 32], strides = [1, 1, 1]} : vector<8x2x32xf32> to vector<1x2x32xf32>
    %118 = vector.shape_cast %117 : vector<1x2x32xf32> to vector<2x32xf32>
    %119 = arith.mulf %118, %106 : vector<2x32xf32>
    %120 = vector.extract_strided_slice %32 {offsets = [5, 0, 0], sizes = [1, 2, 32], strides = [1, 1, 1]} : vector<8x2x32xf32> to vector<1x2x32xf32>
    %121 = vector.shape_cast %120 : vector<1x2x32xf32> to vector<2x32xf32>
    %122 = arith.addf %119, %121 : vector<2x32xf32>
    %123 = vector.extract_strided_slice %29 {offsets = [5, 0, 0], sizes = [1, 2, 32], strides = [1, 1, 1]} : vector<8x2x32xf32> to vector<1x2x32xf32>
    %124 = vector.shape_cast %123 : vector<1x2x32xf32> to vector<2x32xf32>
    %125 = math.tanh %122 : vector<2x32xf32>
    %126 = arith.mulf %124, %125 : vector<2x32xf32>
    %127 = vector.extract_strided_slice %35 {offsets = [5, 0, 0], sizes = [1, 2, 32], strides = [1, 1, 1]} : vector<8x2x32xf32> to vector<1x2x32xf32>
    %128 = vector.shape_cast %127 : vector<1x2x32xf32> to vector<2x32xf32>
    %129 = arith.addf %126, %128 : vector<2x32xf32>
    %c5 = arith.constant 5 : index
    %c0_25 = arith.constant 0 : index
    %c0_26 = arith.constant 0 : index
    %130 = vector.load %arg4[%c5, %c0_25, %c0_26] : memref<8x2x32xf32, #tpu.memory_space<vmem>>, vector<1x2x32xf32>
    %131 = vector.shape_cast %130 : vector<1x2x32xf32> to vector<2x32xf32>
    %132 = vector.shape_cast %129 : vector<2x32xf32> to vector<1x2x32xf32>
    tpu.vector_store %arg4[%c5, %c0_25, %c0_26], %132 {strides = array<i32>} : memref<8x2x32xf32, #tpu.memory_space<vmem>>, vector<1x2x32xf32>,
    %133 = vector.extract_strided_slice %18 {offsets = [6, 0, 0], sizes = [1, 2, 32], strides = [1, 1, 1]} : vector<8x2x32xf32> to vector<1x2x32xf32>
    %134 = vector.shape_cast %133 : vector<1x2x32xf32> to vector<2x32xf32>
    %135 = arith.mulf %134, %122 : vector<2x32xf32>
    %136 = vector.extract_strided_slice %32 {offsets = [6, 0, 0], sizes = [1, 2, 32], strides = [1, 1, 1]} : vector<8x2x32xf32> to vector<1x2x32xf32>
    %137 = vector.shape_cast %136 : vector<1x2x32xf32> to vector<2x32xf32>
    %138 = arith.addf %135, %137 : vector<2x32xf32>
    %139 = vector.extract_strided_slice %29 {offsets = [6, 0, 0], sizes = [1, 2, 32], strides = [1, 1, 1]} : vector<8x2x32xf32> to vector<1x2x32xf32>
    %140 = vector.shape_cast %139 : vector<1x2x32xf32> to vector<2x32xf32>
    %141 = math.tanh %138 : vector<2x32xf32>
    %142 = arith.mulf %140, %141 : vector<2x32xf32>
    %143 = vector.extract_strided_slice %35 {offsets = [6, 0, 0], sizes = [1, 2, 32], strides = [1, 1, 1]} : vector<8x2x32xf32> to vector<1x2x32xf32>
    %144 = vector.shape_cast %143 : vector<1x2x32xf32> to vector<2x32xf32>
    %145 = arith.addf %142, %144 : vector<2x32xf32>
    %c6 = arith.constant 6 : index
    %c0_27 = arith.constant 0 : index
    %c0_28 = arith.constant 0 : index
    %146 = vector.load %arg4[%c6, %c0_27, %c0_28] : memref<8x2x32xf32, #tpu.memory_space<vmem>>, vector<1x2x32xf32>
    %147 = vector.shape_cast %146 : vector<1x2x32xf32> to vector<2x32xf32>
    %148 = vector.shape_cast %145 : vector<2x32xf32> to vector<1x2x32xf32>
    tpu.vector_store %arg4[%c6, %c0_27, %c0_28], %148 {strides = array<i32>} : memref<8x2x32xf32, #tpu.memory_space<vmem>>, vector<1x2x32xf32>,
    %149 = vector.extract_strided_slice %18 {offsets = [7, 0, 0], sizes = [1, 2, 32], strides = [1, 1, 1]} : vector<8x2x32xf32> to vector<1x2x32xf32>
    %150 = vector.shape_cast %149 : vector<1x2x32xf32> to vector<2x32xf32>
    %151 = arith.mulf %150, %138 : vector<2x32xf32>
    %152 = vector.extract_strided_slice %32 {offsets = [7, 0, 0], sizes = [1, 2, 32], strides = [1, 1, 1]} : vector<8x2x32xf32> to vector<1x2x32xf32>
    %153 = vector.shape_cast %152 : vector<1x2x32xf32> to vector<2x32xf32>
    %154 = arith.addf %151, %153 : vector<2x32xf32>
    %155 = vector.extract_strided_slice %29 {offsets = [7, 0, 0], sizes = [1, 2, 32], strides = [1, 1, 1]} : vector<8x2x32xf32> to vector<1x2x32xf32>
    %156 = vector.shape_cast %155 : vector<1x2x32xf32> to vector<2x32xf32>
    %157 = math.tanh %154 : vector<2x32xf32>
    %158 = arith.mulf %156, %157 : vector<2x32xf32>
    %159 = vector.extract_strided_slice %35 {offsets = [7, 0, 0], sizes = [1, 2, 32], strides = [1, 1, 1]} : vector<8x2x32xf32> to vector<1x2x32xf32>
    %160 = vector.shape_cast %159 : vector<1x2x32xf32> to vector<2x32xf32>
    %161 = arith.addf %158, %160 : vector<2x32xf32>
    %c7 = arith.constant 7 : index
    %c0_29 = arith.constant 0 : index
    %c0_30 = arith.constant 0 : index
    %162 = vector.load %arg4[%c7, %c0_29, %c0_30] : memref<8x2x32xf32, #tpu.memory_space<vmem>>, vector<1x2x32xf32>
    %163 = vector.shape_cast %162 : vector<1x2x32xf32> to vector<2x32xf32>
    %164 = vector.shape_cast %161 : vector<2x32xf32> to vector<1x2x32xf32>
    tpu.vector_store %arg4[%c7, %c0_29, %c0_30], %164 {strides = array<i32>} : memref<8x2x32xf32, #tpu.memory_space<vmem>>, vector<1x2x32xf32>,
    %c0_31 = arith.constant 0 : index
    %c0_32 = arith.constant 0 : index
    %c0_33 = arith.constant 0 : index
    %165 = vector.load %arg4[%c0_31, %c0_32, %c0_33] : memref<8x2x32xf32, #tpu.memory_space<vmem>>, vector<8x2x32xf32>
    %166 = vector.shape_cast %165 : vector<8x2x32xf32> to vector<16x32xf32>
    %c1_34 = arith.constant 1 : index
    %c0_35 = arith.constant 0 : index
    %c0_36 = arith.constant 0 : index
    %167 = vector.load %arg1[%c1_34, %c0_35, %c0_36] : memref<2x32x96xf32, #tpu.memory_space<vmem>>, vector<1x32x96xf32>
    %168 = vector.shape_cast %167 : vector<1x32x96xf32> to vector<32x96xf32>
    %cst_37 = arith.constant dense<0.000000e+00> : vector<16x96xf32>
    %169 = tpu.matmul %166, %168, %cst_37 {dimension_numbers = #tpu.dot_dimension_numbers<[1], [0], [0], [1], [0, 0, 1, 1], [], []>} : vector<16x32xf32>, vector<32x96xf32>, vector<16x96xf32> -> vector<16x96xf32>
    %170 = vector.shape_cast %169 : vector<16x96xf32> to vector<8x2x96xf32>
    %171 = vector.extract_strided_slice %170 {offsets = [0, 0, 0], sizes = [8, 2, 32], strides = [1, 1, 1]} : vector<8x2x96xf32> to vector<8x2x32xf32>
    %172 = vector.extract_strided_slice %170 {offsets = [0, 0, 32], sizes = [8, 2, 32], strides = [1, 1, 1]} : vector<8x2x96xf32> to vector<8x2x32xf32>
    %173 = vector.extract_strided_slice %1 {offsets = [1, 0, 0, 0], sizes = [1, 1, 1, 32], strides = [1, 1, 1, 1]} : vector<2x2x1x32xf32> to vector<1x1x1x32xf32>
    %174 = vector.shape_cast %173 : vector<1x1x1x32xf32> to vector<1x32xf32>
    %175 = vector.shape_cast %174 : vector<1x32xf32> to vector<1x1x32xf32>
    %176 = vector.broadcast %175 : vector<1x1x32xf32> to vector<8x2x32xf32>
    %177 = arith.addf %172, %176 : vector<8x2x32xf32>
    %178 = arith.negf %177 : vector<8x2x32xf32>
    %179 = math.exp %178 : vector<8x2x32xf32>
    %cst_38 = arith.constant 1.000000e+00 : f32
    %180 = vector.broadcast %cst_38 : f32 to vector<8x2x32xf32>
    %181 = arith.addf %180, %179 : vector<8x2x32xf32>
    %182 = arith.divf %180, %181 : vector<8x2x32xf32>
    %183 = vector.extract_strided_slice %170 {offsets = [0, 0, 64], sizes = [8, 2, 32], strides = [1, 1, 1]} : vector<8x2x96xf32> to vector<8x2x32xf32>
    %184 = vector.extract_strided_slice %1 {offsets = [1, 1, 0, 0], sizes = [1, 1, 1, 32], strides = [1, 1, 1, 1]} : vector<2x2x1x32xf32> to vector<1x1x1x32xf32>
    %185 = vector.shape_cast %184 : vector<1x1x1x32xf32> to vector<1x32xf32>
    %186 = vector.shape_cast %185 : vector<1x32xf32> to vector<1x1x32xf32>
    %187 = vector.broadcast %186 : vector<1x1x32xf32> to vector<8x2x32xf32>
    %188 = arith.addf %183, %187 : vector<8x2x32xf32>
    %189 = arith.negf %188 : vector<8x2x32xf32>
    %190 = math.exp %189 : vector<8x2x32xf32>
    %cst_39 = arith.constant 1.000000e+00 : f32
    %191 = vector.broadcast %cst_39 : f32 to vector<8x2x32xf32>
    %192 = arith.addf %191, %190 : vector<8x2x32xf32>
    %193 = arith.divf %191, %192 : vector<8x2x32xf32>
    %cst_40 = arith.constant 1.000000e+00 : f32
    %194 = vector.broadcast %cst_40 : f32 to vector<8x2x32xf32>
    %195 = arith.subf %194, %182 : vector<8x2x32xf32>
    %196 = arith.mulf %195, %171 : vector<8x2x32xf32>
    %cst_41 = arith.constant 0.000000e+00 : f32
    %197 = vector.broadcast %cst_41 : f32 to vector<2x32xf32>
    %198 = vector.extract_strided_slice %182 {offsets = [0, 0, 0], sizes = [1, 2, 32], strides = [1, 1, 1]} : vector<8x2x32xf32> to vector<1x2x32xf32>
    %199 = vector.shape_cast %198 : vector<1x2x32xf32> to vector<2x32xf32>
    %200 = arith.mulf %199, %197 : vector<2x32xf32>
    %201 = vector.extract_strided_slice %196 {offsets = [0, 0, 0], sizes = [1, 2, 32], strides = [1, 1, 1]} : vector<8x2x32xf32> to vector<1x2x32xf32>
    %202 = vector.shape_cast %201 : vector<1x2x32xf32> to vector<2x32xf32>
    %203 = arith.addf %200, %202 : vector<2x32xf32>
    %204 = vector.extract_strided_slice %182 {offsets = [1, 0, 0], sizes = [1, 2, 32], strides = [1, 1, 1]} : vector<8x2x32xf32> to vector<1x2x32xf32>
    %205 = vector.shape_cast %204 : vector<1x2x32xf32> to vector<2x32xf32>
    %206 = arith.mulf %205, %203 : vector<2x32xf32>
    %207 = vector.extract_strided_slice %196 {offsets = [1, 0, 0], sizes = [1, 2, 32], strides = [1, 1, 1]} : vector<8x2x32xf32> to vector<1x2x32xf32>
    %208 = vector.shape_cast %207 : vector<1x2x32xf32> to vector<2x32xf32>
    %209 = arith.addf %206, %208 : vector<2x32xf32>
    %210 = vector.extract_strided_slice %182 {offsets = [2, 0, 0], sizes = [1, 2, 32], strides = [1, 1, 1]} : vector<8x2x32xf32> to vector<1x2x32xf32>
    %211 = vector.shape_cast %210 : vector<1x2x32xf32> to vector<2x32xf32>
    %212 = arith.mulf %211, %209 : vector<2x32xf32>
    %213 = vector.extract_strided_slice %196 {offsets = [2, 0, 0], sizes = [1, 2, 32], strides = [1, 1, 1]} : vector<8x2x32xf32> to vector<1x2x32xf32>
    %214 = vector.shape_cast %213 : vector<1x2x32xf32> to vector<2x32xf32>
    %215 = arith.addf %212, %214 : vector<2x32xf32>
    %216 = vector.extract_strided_slice %182 {offsets = [3, 0, 0], sizes = [1, 2, 32], strides = [1, 1, 1]} : vector<8x2x32xf32> to vector<1x2x32xf32>
    %217 = vector.shape_cast %216 : vector<1x2x32xf32> to vector<2x32xf32>
    %218 = arith.mulf %217, %215 : vector<2x32xf32>
    %219 = vector.extract_strided_slice %196 {offsets = [3, 0, 0], sizes = [1, 2, 32], strides = [1, 1, 1]} : vector<8x2x32xf32> to vector<1x2x32xf32>
    %220 = vector.shape_cast %219 : vector<1x2x32xf32> to vector<2x32xf32>
    %221 = arith.addf %218, %220 : vector<2x32xf32>
    %222 = vector.extract_strided_slice %182 {offsets = [4, 0, 0], sizes = [1, 2, 32], strides = [1, 1, 1]} : vector<8x2x32xf32> to vector<1x2x32xf32>
    %223 = vector.shape_cast %222 : vector<1x2x32xf32> to vector<2x32xf32>
    %224 = arith.mulf %223, %221 : vector<2x32xf32>
    %225 = vector.extract_strided_slice %196 {offsets = [4, 0, 0], sizes = [1, 2, 32], strides = [1, 1, 1]} : vector<8x2x32xf32> to vector<1x2x32xf32>
    %226 = vector.shape_cast %225 : vector<1x2x32xf32> to vector<2x32xf32>
    %227 = arith.addf %224, %226 : vector<2x32xf32>
    %228 = vector.extract_strided_slice %182 {offsets = [5, 0, 0], sizes = [1, 2, 32], strides = [1, 1, 1]} : vector<8x2x32xf32> to vector<1x2x32xf32>
    %229 = vector.shape_cast %228 : vector<1x2x32xf32> to vector<2x32xf32>
    %230 = arith.mulf %229, %227 : vector<2x32xf32>
    %231 = vector.extract_strided_slice %196 {offsets = [5, 0, 0], sizes = [1, 2, 32], strides = [1, 1, 1]} : vector<8x2x32xf32> to vector<1x2x32xf32>
    %232 = vector.shape_cast %231 : vector<1x2x32xf32> to vector<2x32xf32>
    %233 = arith.addf %230, %232 : vector<2x32xf32>
    %234 = vector.extract_strided_slice %182 {offsets = [6, 0, 0], sizes = [1, 2, 32], strides = [1, 1, 1]} : vector<8x2x32xf32> to vector<1x2x32xf32>
    %235 = vector.shape_cast %234 : vector<1x2x32xf32> to vector<2x32xf32>
    %236 = arith.mulf %235, %233 : vector<2x32xf32>
    %237 = vector.extract_strided_slice %196 {offsets = [6, 0, 0], sizes = [1, 2, 32], strides = [1, 1, 1]} : vector<8x2x32xf32> to vector<1x2x32xf32>
    %238 = vector.shape_cast %237 : vector<1x2x32xf32> to vector<2x32xf32>
    %239 = arith.addf %236, %238 : vector<2x32xf32>
    %240 = vector.extract_strided_slice %182 {offsets = [7, 0, 0], sizes = [1, 2, 32], strides = [1, 1, 1]} : vector<8x2x32xf32> to vector<1x2x32xf32>
    %241 = vector.shape_cast %240 : vector<1x2x32xf32> to vector<2x32xf32>
    %242 = arith.mulf %241, %239 : vector<2x32xf32>
    %243 = vector.extract_strided_slice %196 {offsets = [7, 0, 0], sizes = [1, 2, 32], strides = [1, 1, 1]} : vector<8x2x32xf32> to vector<1x2x32xf32>
    %244 = vector.shape_cast %243 : vector<1x2x32xf32> to vector<2x32xf32>
    %245 = arith.addf %242, %244 : vector<2x32xf32>
    %246 = vector.extract_strided_slice %193 {offsets = [7, 0, 0], sizes = [1, 2, 32], strides = [1, 1, 1]} : vector<8x2x32xf32> to vector<1x2x32xf32>
    %247 = vector.shape_cast %246 : vector<1x2x32xf32> to vector<2x32xf32>
    %248 = math.tanh %245 : vector<2x32xf32>
    %249 = arith.mulf %247, %248 : vector<2x32xf32>
    %250 = vector.extract_strided_slice %193 {offsets = [7, 0, 0], sizes = [1, 2, 32], strides = [1, 1, 1]} : vector<8x2x32xf32> to vector<1x2x32xf32>
    %251 = vector.shape_cast %250 : vector<1x2x32xf32> to vector<2x32xf32>
    %cst_42 = arith.constant 1.000000e+00 : f32
    %252 = vector.broadcast %cst_42 : f32 to vector<2x32xf32>
    %253 = arith.subf %252, %251 : vector<2x32xf32>
    %254 = vector.extract_strided_slice %165 {offsets = [7, 0, 0], sizes = [1, 2, 32], strides = [1, 1, 1]} : vector<8x2x32xf32> to vector<1x2x32xf32>
    %255 = vector.shape_cast %254 : vector<1x2x32xf32> to vector<2x32xf32>
    %256 = arith.mulf %253, %255 : vector<2x32xf32>
    %257 = arith.addf %249, %256 : vector<2x32xf32>
    %c0_43 = arith.constant 0 : index
    %c0_44 = arith.constant 0 : index
    %c0_45 = arith.constant 0 : index
    %258 = vector.load %arg3[%c0_43, %c0_44, %c0_45] : memref<1x2x32xf32, #tpu.memory_space<vmem>>, vector<1x2x32xf32>
    %259 = vector.shape_cast %258 : vector<1x2x32xf32> to vector<2x32xf32>
    %260 = vector.shape_cast %257 : vector<2x32xf32> to vector<1x2x32xf32>
    tpu.vector_store %arg3[%c0_43, %c0_44, %c0_45], %260 {strides = array<i32>} : memref<1x2x32xf32, #tpu.memory_space<vmem>>, vector<1x2x32xf32>,
    return
  }
}

</mosaic_0001>

<bundles_post_ra>
// kernel: model_forward.1
= control target key start
LH: loop header
LB: loop body
LE: loop exit
PB: predicated region body
PF: predicated region fallthrough
CT: control target
= control target key end

     0   :  { %8 = vsyncpa [#allocation4], 0  ;;  %s1822_s0 = inlined_call_operand.hbm [shape: f32[8,2,32], index: 0, kind: input, shape index: {}]   ;;  %s1823_s1 = inlined_call_operand.hbm [shape: f32[2,32,96], index: 1, kind: input, shape index: {}]   ;;  %s1824_s2 = inlined_call_operand.hbm [shape: f32[2,2,1,32], index: 2, kind: input, shape index: {}]   ;;  %s1825_s3 = inlined_call_operand.hbm [shape: f32[1,2,32], index: 3, kind: output, shape index: {}]  }
   0x1   :  { %9 = vsyncpa [#allocation7], 0  ;;  %s28_s14 = sshll.u32 %s1823_s1, 4  ;;  %s29_s14 = int_to_ptr.hbm [resolvable:$true] %s28_s14 }
   0x2   :  { %10 = vsyncpa [#allocation5], 0  ;;  %s1325_s15 = smov [#allocation6]   ;;  %s15_s19 = sshll.u32 %s1822_s0, 4  ;;  %s16_s19 = int_to_ptr.hbm [resolvable:$true] %s15_s19 }
   0x3   :  { %s30_s16 = sshll.u32 %s1325_s15, 4  ;;  %s1326_s20 = smov 128   ;;  %s31_s16 = int_to_ptr.vmem [resolvable:$true] %s30_s16 }
   0x4   :  { %s1327_s21 = smov 8   ;;  %s1328_s22 = smov [#allocation3]  }
   0x5   :  { %36 = dma.hbm_to_vmem [thread:$0]  %s29_s14, 1024, %s31_s16, [#allocation7], %s1326_s20, %s1326_s20, %s1327_s21  }
   0x6   :  { %s17_s23 = sshll.u32 %s1328_s22, 4  ;;  %s1329_s24 = smov 32   ;;  %s18_s23 = int_to_ptr.vmem [resolvable:$true] %s17_s23 }
   0x7   :  { %s1330_s25 = smov 2   ;;  %s41_s27 = sshll.u32 %s1824_s2, 4  ;;  %s42_s27 = int_to_ptr.hbm [resolvable:$true] %s41_s27 }
   0x8   :  { %23 = dma.hbm_to_vmem [thread:$0]  %s16_s19, 256, %s18_s23, [#allocation4], %s1329_s24, %s1329_s24, %s1330_s25  }
   0x9   :  { %s1331_s28 = smov [#allocation8]   ;;  %s1332_s0 = smov 16  }
   0xa   :  { %s43_s29 = sshll.u32 %s1331_s28, 4  ;;  %s1333_s30 = smov 1   ;;  %s44_s29 = int_to_ptr.vmem [resolvable:$true] %s43_s29 }
   0xb   :  { %49 = dma.hbm_to_vmem [thread:$0]  %s42_s27, 64, %s44_s29, [#allocation7], %s1332_s0, %s1332_s0, %s1333_s30  }
   0xc   :  { %1319 = dma.done.wait [#allocation4], 256  }
   0xd   :  { %1320 = vsyncadd [#allocation4], 4294967040 }
   0xe   :  { %1321 = dma.done.wait [#allocation7], 1088  }
   0xf   :  { %1322 = vsyncadd [#allocation7], 4294966208  ;;  %v77_v0 = vld [vmem:[#allocation6 + $0x18] sm:$0xff]  ;;  %v76_v1 = vld [vmem:[#allocation6 + $0x10] sm:$0xff]  ;;  %s1334_s2 = smov 64   ;;  %vm103_vm0 = vcmask 261120  }
  0x10   :  { %120 = vmatpush.msra.mxu0 %v77_v0  ;;  %1082 = vmatpush.msra.mxu2 %v77_v0  ;;  %v75_v2 = vld [vmem:[#allocation6 + $0x8] sm:$0xff]  ;;  %v62_v3 = vld [vmem:[#allocation3] sm:$0x3]  ;;  %v63_v4 = vld [vmem:[#allocation3 + $0x2] sm:$0x3]  ;;  %s1335_s4 = smov [#allocation9]  }
  0x11   :  { %v74_v5 = vld [vmem:[#allocation6] sm:$0xff]  ;;  %v64_v6 = vld [vmem:[#allocation3 + $0x4] sm:$0x3]  ;;  %v1367_v7 = vld [vmem:[#allocation3 + $0x6] sm:$0x3]  ;;  %s1040_s5 = sshll.u32 %s1335_s4, 4  ;;  %s1041_s5 = int_to_ptr.vmem [resolvable:$true] %s1040_s5 }
  0x12   :  { %86 = vst [vmem:[#allocation1] ss:$4 sm:$0xff] %v62_v3  ;;  %121 = vmatpush.msra.mxu0 %v76_v1  ;;  %1083 = vmatpush.msra.mxu2 %v76_v1  ;;  %v1369_v8 = vld [vmem:[#allocation3 + $0x8] sm:$0x3]  ;;  %v1371_v9 = vld [vmem:[#allocation3 + $0xa] sm:$0x3] }
  0x13   :  { %88 = vst [vmem:[#allocation1 + $0x1] ss:$4 sm:$0xff] %v63_v4  ;;  %v1373_v10 = vld [vmem:[#allocation3 + $0xc] sm:$0x3]  ;;  %v1375_v11 = vld [vmem:[#allocation3 + $0xe] sm:$0x3] }
  0x14   :  { %90 = vst [vmem:[#allocation1 + $0x2] ss:$4 sm:$0xff] %v64_v6  ;;  %122 = vmatpush.msra.mxu0 %v75_v2  ;;  %1084 = vmatpush.msra.mxu2 %v75_v2  ;;  %v1101_v12 = vld [vmem:[#allocation8] ss:$0 sm:$0xff]  ;;  %v1102_v13 = vld [vmem:[#allocation8 + $0x1] ss:$0 sm:$0xff] }
  0x15   :  { %92 = vst [vmem:[#allocation1 + $0x3] ss:$4 sm:$0xff] %v1367_v7  ;;  %147 = vrot.lane.b32.xlu0 %v1101_v12, %s1329_s24  ;;  %312 = vrot.lane.b32.xlu2 %v1102_v13, %s1334_s2  ;;  %s1042_s8 = sshll.u32 %s1825_s3, 4  ;;  %s1043_s8 = int_to_ptr.hbm [resolvable:$true] %s1042_s8 }
  0x16   :  { %94 = vst [vmem:[#allocation1 + $0x20] ss:$4 sm:$0xff] %v1369_v8  ;;  %123 = vmatpush.msra.mxu0 %v74_v5  ;;  %1085 = vmatpush.msra.mxu2 %v74_v5 }
  0x17   :  { %96 = vst [vmem:[#allocation1 + $0x21] ss:$4 sm:$0xff] %v1371_v9 }
  0x18   :  { %98 = vst [vmem:[#allocation1 + $0x22] ss:$4 sm:$0xff] %v1373_v10 }
  0x19   :  { %100 = vst [vmem:[#allocation1 + $0x23] ss:$4 sm:$0xff] %v1375_v11 }
  0x1c   :  { %v101_v14 = vld.sshfl [vmem:[#allocation1] sm:$0xff pattern:$0x73625140] }
  0x1d   :  { %1053 = vmatmul.msk.f32.vlgmr.msra.gmra.mxu0 %vm103_vm0, %v101_v14 }
  0x20   :  { %v102_v15 = vld.sshfl [vmem:[#allocation1 + $0x20] sm:$0xff pattern:$0x73625140] }
  0x21   :  { %1054 = vmatmul.msk.f32.vlgmr.msra.gmra.mxu2 %vm103_vm0, %v102_v15 }
  0x87   :  { %v148_v24 = vpop.permute.xlu0 %147 }
  0x9a   :  { %v1386_v16 = vpop.f32.mrf.mxu0 }
  0x9b   :  { %483 = vrot.lane.b32.xlu0 %v1386_v16, %s1329_s24  ;;  %v1391_v17 = vrot.slane %v1386_v16, 6  ;;  %v1394_v18 = vrot.slane %v1386_v16, 2  ;;  %v1401_v19 = vrot.slane %v1386_v16, 4  ;;  %v150_v25 = vadd.f32 %v148_v24, %v1386_v16 }
  0x9d   :  { %489 = vrot.lane.b32.xlu2 %v1391_v17, %s1329_s24  ;;  %485 = vrot.lane.b32.xlu1 %v1394_v18, %s1329_s24  ;;  %v1055_v26 = vmul.f32 -1.442695, %v150_v25  ;;  %v151_v27 = vadd.f32 %v148_v24, %v1394_v18  ;;  %v153_v28 = vadd.f32 %v148_v24, %v1391_v17  ;;  %v152_v30 = vadd.f32 %v148_v24, %v1401_v19 }
  0x9f   :  { %1105 = vpow2.f32 %v1055_v26  ;;  %v1056_v29 = vmul.f32 -1.442695, %v151_v27  ;;  %v1058_v31 = vmul.f32 -1.442695, %v153_v28  ;;  %v1057_v33 = vmul.f32 -1.442695, %v152_v30 }
  0xa1   :  { %1107 = vpow2.f32 %v1056_v29 }
  0xa2   :  { %1109 = vpow2.f32 %v1058_v31 }
  0xa3   :  { %1111 = vpow2.f32 %v1057_v33 }
  0xa4   :  { %v1403_v20 = vpop.f32.mrf.mxu2 }
  0xa5   :  { %491 = vrot.lane.b32.xlu0 %v1403_v20, %s1329_s24  ;;  %v1408_v21 = vrot.slane %v1403_v20, 4  ;;  %487 = vrot.lane.b32.xlu1 %v1401_v19, %s1329_s24  ;;  %v1415_v22 = vrot.slane %v1403_v20, 2  ;;  %v1418_v23 = vrot.slane %v1403_v20, 6  ;;  %v1106_v32 = vpop.eup %1105  ;;  %v154_v36 = vadd.f32 %v148_v24, %v1403_v20 }
  0xa6   :  { %v182_v34 = vadd.f32 1.0, %v1106_v32 }
  0xa7   :  { %495 = vrot.lane.b32.xlu2 %v1408_v21, %s1329_s24  ;;  %v1108_v35 = vpop.eup %1107  ;;  %v1059_v39 = vmul.f32 -1.442695, %v154_v36  ;;  %v156_v40 = vadd.f32 %v148_v24, %v1408_v21  ;;  %v155_v41 = vadd.f32 %v148_v24, %v1415_v22  ;;  %v157_v48 = vadd.f32 %v148_v24, %v1418_v23 }
  0xa8   :  { %1113 = vrcp.f32 %v182_v34  ;;  %v1432_v37 = vadd.f32 1.0, %v1108_v35  ;;  %v1110_v38 = vpop.eup %1109  ;;  %vm195_vm2 = vweird.f32 %v182_v34  ;;  %v199_v12 = vand.u32 2147483647, %v182_v34 }
  0xa9   :  { %v1112_v42 = vpop.eup %1111  ;;  %v1436_v43 = vadd.f32 1.0, %v1110_v38  ;;  %v1061_v44 = vmul.f32 -1.442695, %v156_v40  ;;  %v1060_v46 = vmul.f32 -1.442695, %v155_v41 }
  0xaa   :  { %1115 = vrcp.f32 %v1432_v37  ;;  %v1439_v47 = vadd.f32 1.0, %v1112_v42  ;;  %v1062_v52 = vmul.f32 -1.442695, %v157_v48  ;;  %vm200_vm5 = vcmp.eq.f32.partialorder %v199_v12, 8.507059e+37 }
  0xab   :  { %1117 = vpow2.f32 %v1059_v39  ;;  %v216_v28 = vand.u32 2147483648, %v1432_v37  ;;  %vm210_vm6 = vweird.f32 %v1432_v37  ;;  %v214_v31 = vand.u32 2147483647, %v1432_v37 }
  0xac   :  { %1119 = vrcp.f32 %v1436_v43  ;;  %v244_v36 = vand.u32 2147483647, %v1436_v43  ;;  %vm240_vm11 = vweird.f32 %v1436_v43  ;;  %vm225_vm13 = vweird.f32 %v1439_v47 }
  0xad   :  { %523 = vrot.lane.b32.xlu0 %v62_v3, %s1334_s2  ;;  %493 = vrot.lane.b32.xlu1 %v1415_v22, %s1329_s24  ;;  %1121 = vpow2.f32 %v1061_v44  ;;  %v201_v3 = vand.u32 2147483648, %v182_v34  ;;  %v217_v40 = vor.u32 1.1754944e-38, %v216_v28  ;;  %vm215_vm9 = vcmp.eq.f32.partialorder %v214_v31, 8.507059e+37 }
  0xae   :  { %v1114_v45 = vpop.eup %1113  ;;  %1123 = vpow2.f32 %v1060_v46  ;;  %vm1515_vm14 = vcmp.eq.f32.partialorder %v244_v36, 8.507059e+37 }
  0xaf   :  { %497 = vrot.lane.b32.xlu2 %v1418_v23, %s1329_s24  ;;  %v191_v49 = vmul.f32 %v1114_v45, %v182_v34  ;;  %1125 = vrcp.f32 %v1439_v47  ;;  %vm196_vm1 = vweird.f32 %v1114_v45  ;;  %v202_v25 = vor.u32 1.1754944e-38, %v201_v3 }
  0xb0   :  { %v1443_v50 = vpop.eup %1115  ;;  %1127 = vpow2.f32 %v1062_v52  ;;  %vm197_vm3 = vmor %vm195_vm2, %vm196_vm1 }
  0xb1   :  { %v1118_v51 = vpop.eup %1117  ;;  %v192_v53 = vsub.f32 1.0, %v191_v49  ;;  %v206_v56 = vmul.f32 %v1443_v50, %v1432_v37  ;;  %vm211_vm4 = vweird.f32 %v1443_v50 }
  0xb2   :  { %v1446_v54 = vpop.eup %1119  ;;  %v1448_v55 = vadd.f32 1.0, %v1118_v51  ;;  %vm1481_vm7 = vmor %vm210_vm6, %vm211_vm4 }
  0xb3   :  { %v1122_v57 = vpop.eup %1121  ;;  %v193_v60 = vmul.f32 %v1114_v45, %v192_v53  ;;  %v207_v61 = vsub.f32 1.0, %v206_v56  ;;  %v236_v63 = vmul.f32 %v1446_v54, %v1436_v43  ;;  %vm241_vm8 = vweird.f32 %v1446_v54 }
  0xb4   :  { %v1124_v58 = vpop.eup %1123  ;;  %1129 = vrcp.f32 %v1448_v55  ;;  %v1459_v0 = vadd.f32 1.0, %v1122_v57  ;;  %vm1506_vm12 = vmor %vm240_vm11, %vm241_vm8  ;;  %v229_v56 = vand.u32 2147483647, %v1439_v47  ;;  %vm255_vm1 = vweird.f32 %v1448_v55 }
  0xb5   :  { %525 = vrot.lane.b32.xlu0 %v63_v4, %s1334_s2  ;;  %v1452_v59 = vpop.eup %1125  ;;  %v1455_v62 = vadd.f32 1.0, %v1124_v58  ;;  %v194_v2 = vadd.f32 %v1114_v45, %v193_v60  ;;  %v208_v4 = vmul.f32 %v1443_v50, %v207_v61  ;;  %v246_v60 = vand.u32 2147483648, %v1436_v43 }
  0xb6   :  { %v221_v1 = vmul.f32 %v1452_v59, %v1439_v47  ;;  %v1128_v5 = vpop.eup %1127  ;;  %vm226_vm10 = vweird.f32 %v1452_v59  ;;  %v259_v28 = vand.u32 2147483647, %v1448_v55  ;;  %vm285_vm8 = vweird.f32 %v1459_v0 }
  0xb7   :  { %527 = vrot.lane.b32.xlu2 %v64_v6, %s1334_s2  ;;  %1131 = vrcp.f32 %v1455_v62  ;;  %v237_v6 = vsub.f32 1.0, %v236_v63  ;;  %v198_v15 = vsel %vm197_vm3, %v1114_v45, %v194_v2  ;;  %v1468_v24 = vadd.f32 1.0, %v1128_v5  ;;  %v1498_v45 = vpop.permute.xlu2 %312  ;;  %vm1523_vm15 = vmor %vm225_vm13, %vm226_vm10 }
  0xb8   :  { %1133 = vrcp.f32 %v1459_v0  ;;  %v222_v14 = vsub.f32 1.0, %v221_v1  ;;  %v209_v26 = vadd.f32 %v1443_v50, %v208_v4  ;;  %v203_v30 = vsel %vm200_vm5, %v202_v25, %v198_v15 }
  0xb9   :  { %v238_v27 = vmul.f32 %v1446_v54, %v237_v6  ;;  %1135 = vrcp.f32 %v1468_v24  ;;  %v475_v39 = vsub.f32 1.0, %v203_v30  ;;  %v555_v53 = vmul.f32 0.0, %v203_v30 }
  0xba   :  { %v1465_v13 = vpop.eup %1129  ;;  %v223_v32 = vmul.f32 %v1452_v59, %v222_v14  ;;  %v213_v37 = vsel %vm1481_vm7, %v1443_v50, %v209_v26  ;;  %v231_v50 = vand.u32 2147483648, %v1439_v47  ;;  %vm230_vm3 = vcmp.eq.f32.partialorder %v229_v56, 8.507059e+37 }
  0xbb   :  { %v251_v29 = vmul.f32 %v1465_v13, %v1448_v55  ;;  %v239_v38 = vadd.f32 %v1446_v54, %v238_v27  ;;  %v218_v49 = vsel %vm215_vm9, %v217_v40, %v213_v37  ;;  %vm256_vm2 = vweird.f32 %v1465_v13 }
  0xbc   :  { %v224_v42 = vadd.f32 %v1452_v59, %v223_v32  ;;  %v476_v3 = vsub.f32 1.0, %v218_v49  ;;  %v232_v43 = vor.u32 1.1754944e-38, %v231_v50  ;;  %v247_v14 = vor.u32 1.1754944e-38, %v246_v60  ;;  %vm1547_vm4 = vmor %vm255_vm1, %vm256_vm2 }
  0xbd   :  { %v1479_v33 = vpop.eup %1131  ;;  %v252_v41 = vsub.f32 1.0, %v251_v29  ;;  %v243_v57 = vsel %vm1506_vm12, %v1446_v54, %v239_v38  ;;  %v261_v25 = vand.u32 2147483648, %v1448_v55  ;;  %vm270_vm5 = vweird.f32 %v1455_v62 }
  0xbe   :  { %v1485_v35 = vpop.eup %1133  ;;  %v266_v44 = vmul.f32 %v1479_v33, %v1455_v62  ;;  %v228_v54 = vsel %vm1523_vm15, %v1452_v59, %v224_v42  ;;  %v248_v31 = vsel %vm1515_vm14, %v247_v14, %v243_v57  ;;  %vm271_vm6 = vweird.f32 %v1479_v33 }
  0xbf   :  { %v281_v46 = vmul.f32 %v1485_v35, %v1459_v0  ;;  %v253_v63 = vmul.f32 %v1465_v13, %v252_v41  ;;  %v1527_v47 = vpop.eup %1135  ;;  %v233_v26 = vsel %vm230_vm3, %v232_v43, %v228_v54  ;;  %v274_v41 = vand.u32 2147483647, %v1455_v62  ;;  %vm1568_vm10 = vmor %vm270_vm5, %vm271_vm6 }
  0xc0   :  { %v267_v4 = vsub.f32 1.0, %v266_v44  ;;  %v296_v15 = vmul.f32 %v1527_v47, %v1468_v24  ;;  %v477_v36 = vsub.f32 1.0, %v233_v26  ;;  %v276_v42 = vand.u32 2147483648, %v1455_v62 }
  0xc1   :  { %v282_v5 = vsub.f32 1.0, %v281_v46  ;;  %v254_v59 = vadd.f32 %v1465_v13, %v253_v63  ;;  %vm260_vm7 = vcmp.eq.f32.partialorder %v259_v28, 8.507059e+37  ;;  %vm286_vm9 = vweird.f32 %v1485_v35 }
  0xc2   :  { %v268_v29 = vmul.f32 %v1479_v33, %v267_v4  ;;  %v297_v38 = vsub.f32 1.0, %v296_v15  ;;  %v291_v50 = vand.u32 2147483648, %v1459_v0  ;;  %v478_v51 = vsub.f32 1.0, %v248_v31  ;;  %vm1580_vm12 = vmor %vm285_vm8, %vm286_vm9 }
  0xc3   :  { %v283_v32 = vmul.f32 %v1485_v35, %v282_v5  ;;  %v258_v55 = vsel %vm1547_vm4, %v1465_v13, %v254_v59  ;;  %vm1574_vm11 = vcmp.eq.f32.partialorder %v274_v41, 8.507059e+37  ;;  %v277_v60 = vor.u32 1.1754944e-38, %v276_v42 }
  0xc4   :  { %v298_v56 = vmul.f32 %v1527_v47, %v297_v38  ;;  %vm300_vm14 = vweird.f32 %v1468_v24  ;;  %vm301_vm15 = vweird.f32 %v1527_v47  ;;  %v318_v58 = vadd.f32 %v1498_v45, %v1391_v17 }
  0xc5   :  { %vm1601_vm1 = vmor %vm300_vm14, %vm301_vm15 }
  0xc6   :  { %v299_v15 = vadd.f32 %v1527_v47, %v298_v56 }
  0xf7   :  { %v490_v30 = vpop.permute.xlu2 %489 }
 0x101   :  { %v496_v43 = vpop.permute.xlu2 %495 }
 0x109   :  { %v498_v42 = vpop.permute.xlu2 %497 }
 0x10d   :  { %v484_v48 = vpop.permute.xlu0 %483 }
 0x10e   :  { %v507_v52 = vmul.f32 %v484_v48, %v475_v39  ;;  %v262_v39 = vor.u32 1.1754944e-38, %v261_v25  ;;  %v269_v48 = vadd.f32 %v1479_v33, %v268_v29 }
 0x10f   :  { %v486_v61 = vpop.permute.xlu1 %485 }
 0x110   :  { %v556_v2 = vadd.f32 %v555_v53, %v507_v52  ;;  %v508_v6 = vmul.f32 %v486_v61, %v476_v3  ;;  %v284_v52 = vadd.f32 %v1485_v35, %v283_v32  ;;  %v263_v57 = vsel %vm260_vm7, %v262_v39, %v258_v55 }
 0x111   :  { %v510_v61 = vmul.f32 %v490_v30, %v478_v51  ;;  %v273_v1 = vsel %vm1568_vm10, %v1479_v33, %v269_v48  ;;  %v292_v3 = vor.u32 1.1754944e-38, %v291_v50  ;;  %v306_v33 = vand.u32 2147483648, %v1468_v24 }
 0x112   :  { %1137 = vtanh.f32 %v556_v2  ;;  %v572_v12 = vmul.f32 %v556_v2, %v218_v49  ;;  %v289_v49 = vand.u32 2147483647, %v1459_v0  ;;  %v479_v0 = vsub.f32 1.0, %v263_v57 }
 0x113   :  { %v288_v5 = vsel %vm1580_vm12, %v1485_v35, %v284_v52  ;;  %v307_v30 = vor.u32 1.1754944e-38, %v306_v33  ;;  %v316_v51 = vadd.f32 %v1498_v45, %v1394_v18  ;;  %v321_v33 = vadd.f32 %v1498_v45, %v1408_v21 }
 0x114   :  { %v573_v27 = vadd.f32 %v572_v12, %v508_v6  ;;  %vm1587_vm13 = vcmp.eq.f32.partialorder %v289_v49, 8.507059e+37  ;;  %v304_v6 = vand.u32 2147483647, %v1468_v24  ;;  %v278_v12 = vsel %vm1574_vm11, %v277_v60, %v273_v1 }
 0x115   :  { %v480_v28 = vsub.f32 1.0, %v278_v12  ;;  %v293_v24 = vsel %vm1587_vm13, %v292_v3, %v288_v5  ;;  %v1064_v52 = vmul.f32 -1.442695, %v316_v51  ;;  %v1066_v60 = vmul.f32 -1.442695, %v318_v58 }
 0x116   :  { %v589_v37 = vmul.f32 %v573_v27, %v233_v26  ;;  %1139 = vtanh.f32 %v573_v27  ;;  %vm305_vm2 = vcmp.eq.f32.partialorder %v304_v6, 8.507059e+37  ;;  %v320_v5 = vadd.f32 %v1498_v45, %v1415_v22 }
 0x117   :  { %v488_v40 = vpop.permute.xlu1 %487  ;;  %v492_v54 = vpop.permute.xlu0 %491 }
 0x118   :  { %v1138_v44 = vpop.eup %1137  ;;  %v509_v46 = vmul.f32 %v488_v40, %v477_v36  ;;  %v511_v25 = vmul.f32 %v492_v54, %v479_v0 }
 0x119   :  { %559 = vrot.lane.b32.xlu1 %v1138_v44, %s1329_s24 }
 0x11a   :  { %v590_v53 = vadd.f32 %v589_v37, %v509_v46  ;;  %v481_v37 = vsub.f32 1.0, %v293_v24 }
 0x11c   :  { %1141 = vtanh.f32 %v590_v53  ;;  %v606_v63 = vmul.f32 %v590_v53, %v248_v31  ;;  %v1140_v14 = vpop.eup %1139  ;;  %v303_v31 = vsel %vm1601_vm1, %v1527_v47, %v299_v15  ;;  %v513_v40 = vmul.f32 %v496_v43, %v481_v37 }
 0x11d   :  { %v308_v39 = vsel %vm305_vm2, %v307_v30, %v303_v31 }
 0x11e   :  { %v607_v4 = vadd.f32 %v606_v63, %v510_v61  ;;  %v482_v44 = vsub.f32 1.0, %v308_v39  ;;  %v319_v63 = vadd.f32 %v1498_v45, %v1403_v20 }
 0x11f   :  { %v494_v59 = vpop.permute.xlu1 %493 }
 0x120   :  { %v623_v26 = vmul.f32 %v607_v4, %v263_v57  ;;  %1143 = vtanh.f32 %v607_v4  ;;  %v512_v32 = vmul.f32 %v494_v59, %v480_v28  ;;  %v514_v47 = vmul.f32 %v498_v42, %v482_v44 }
 0x121   :  { %576 = vrot.lane.b32.xlu1 %v1140_v14, %s1329_s24  ;;  %v1067_v54 = vmul.f32 -1.442695, %v319_v63  ;;  %v1068_v14 = vmul.f32 -1.442695, %v320_v5  ;;  %v1069_v59 = vmul.f32 -1.442695, %v321_v33 }
 0x122   :  { %v1142_v35 = vpop.eup %1141  ;;  %v624_v29 = vadd.f32 %v623_v26, %v511_v25 }
 0x123   :  { %593 = vrot.lane.b32.xlu0 %v1142_v35, %s1329_s24  ;;  %v524_v35 = vpop.permute.xlu0 %523 }
 0x124   :  { %v640_v34 = vmul.f32 %v624_v29, %v278_v12  ;;  %1145 = vtanh.f32 %v624_v29 }
 0x126   :  { %v1144_v36 = vpop.eup %1143  ;;  %v641_v38 = vadd.f32 %v640_v34, %v512_v32 }
 0x127   :  { %610 = vrot.lane.b32.xlu2 %v1144_v36, %s1329_s24 }
 0x128   :  { %v657_v41 = vmul.f32 %v641_v38, %v293_v24  ;;  %1147 = vtanh.f32 %v641_v38 }
 0x129   :  { %529 = vrot.lane.b32.xlu1 %v1367_v7, %s1334_s2 }
 0x12a   :  { %v658_v55 = vadd.f32 %v657_v41, %v513_v40  ;;  %v1146_v49 = vpop.eup %1145 }
 0x12b   :  { %531 = vrot.lane.b32.xlu0 %v1369_v8, %s1334_s2 }
 0x12c   :  { %v674_v46 = vmul.f32 %v658_v55, %v308_v39  ;;  %1149 = vtanh.f32 %v658_v55 }
 0x12e   :  { %v675_v48 = vadd.f32 %v674_v46, %v514_v47  ;;  %v1148_v50 = vpop.eup %1147  ;;  %v322_v47 = vadd.f32 %v1498_v45, %v1418_v23 }
 0x12f   :  { %533 = vrot.lane.b32.xlu2 %v1371_v9, %s1334_s2  ;;  %v315_v9 = vadd.f32 %v1498_v45, %v1386_v16 }
 0x130   :  { %1151 = vtanh.f32 %v675_v48 }
 0x131   :  { %627 = vrot.lane.b32.xlu1 %v1146_v49, %s1329_s24  ;;  %v1063_v13 = vmul.f32 -1.442695, %v315_v9 }
 0x132   :  { %v1150_v7 = vpop.eup %1149 }
 0x133   :  { %644 = vrot.lane.b32.xlu0 %v1148_v50, %s1329_s24  ;;  %1153 = vpow2.f32 %v1063_v13 }
 0x134   :  { %1155 = vpow2.f32 %v1064_v52  ;;  %v1070_v52 = vmul.f32 -1.442695, %v322_v47 }
 0x136   :  { %v1152_v8 = vpop.eup %1151 }
 0x137   :  { %661 = vrot.lane.b32.xlu2 %v1150_v7, %s1329_s24 }
 0x139   :  { %535 = vrot.lane.b32.xlu1 %v1373_v10, %s1334_s2  ;;  %v1154_v53 = vpop.eup %1153  ;;  %v317_v10 = vadd.f32 %v1498_v45, %v1401_v19 }
 0x13a   :  { %v347_v56 = vadd.f32 1.0, %v1154_v53 }
 0x13b   :  { %537 = vrot.lane.b32.xlu0 %v1375_v11, %s1334_s2  ;;  %v1065_v57 = vmul.f32 -1.442695, %v317_v10  ;;  %v1156_v11 = vpop.eup %1155 }
 0x13c   :  { %1157 = vrcp.f32 %v347_v56  ;;  %v348_v16 = vadd.f32 1.0, %v1156_v11  ;;  %v366_v12 = vand.u32 2147483648, %v347_v56  ;;  %vm360_vm4 = vweird.f32 %v347_v56 }
 0x13d   :  { %1159 = vpow2.f32 %v1065_v57  ;;  %v364_v15 = vand.u32 2147483647, %v347_v56 }
 0x13e   :  { %1161 = vrcp.f32 %v348_v16  ;;  %v367_v28 = vor.u32 1.1754944e-38, %v366_v12  ;;  %v381_v32 = vand.u32 2147483648, %v348_v16  ;;  %vm375_vm8 = vweird.f32 %v348_v16 }
 0x13f   :  { %1163 = vpow2.f32 %v1066_v60  ;;  %vm365_vm6 = vcmp.eq.f32.partialorder %v364_v15, 8.507059e+37  ;;  %v379_v36 = vand.u32 2147483647, %v348_v16 }
 0x140   :  { %v382_v46 = vor.u32 1.1754944e-38, %v381_v32 }
 0x141   :  { %678 = vrot.lane.b32.xlu1 %v1152_v8, %s1329_s24  ;;  %vm380_vm10 = vcmp.eq.f32.partialorder %v379_v36, 8.507059e+37  ;;  %v526_v8 = vpop.permute.xlu0 %525 }
 0x142   :  { %v1158_v61 = vpop.eup %1157 }
 0x143   :  { %v1160_v62 = vpop.eup %1159  ;;  %v356_v18 = vmul.f32 %v1158_v61, %v347_v56  ;;  %vm361_vm3 = vweird.f32 %v1158_v61 }
 0x144   :  { %v1637_v1 = vadd.f32 1.0, %v1160_v62  ;;  %v1162_v2 = vpop.eup %1161  ;;  %vm362_vm5 = vmor %vm360_vm4, %vm361_vm3 }
 0x145   :  { %v357_v19 = vsub.f32 1.0, %v356_v18  ;;  %v1164_v3 = vpop.eup %1163  ;;  %v371_v0 = vmul.f32 %v1162_v2, %v348_v16  ;;  %vm376_vm7 = vweird.f32 %v1162_v2 }
 0x146   :  { %1165 = vrcp.f32 %v1637_v1  ;;  %v1640_v4 = vadd.f32 1.0, %v1164_v3  ;;  %vm1658_vm9 = vmor %vm375_vm8, %vm376_vm7  ;;  %v396_v53 = vand.u32 2147483648, %v1637_v1  ;;  %vm390_vm12 = vweird.f32 %v1637_v1 }
 0x147   :  { %v358_v17 = vmul.f32 %v1158_v61, %v357_v19  ;;  %1167 = vpow2.f32 %v1067_v54  ;;  %v372_v6 = vsub.f32 1.0, %v371_v0  ;;  %v394_v23 = vand.u32 2147483647, %v1637_v1  ;;  %v528_v0 = vpop.permute.xlu2 %527 }
 0x148   :  { %1169 = vrcp.f32 %v1640_v4  ;;  %vm405_vm1 = vweird.f32 %v1640_v4  ;;  %v409_v3 = vand.u32 2147483647, %v1640_v4 }
 0x149   :  { %v359_v43 = vadd.f32 %v1158_v61, %v358_v17  ;;  %v373_v27 = vmul.f32 %v1162_v2, %v372_v6  ;;  %1171 = vpow2.f32 %v1068_v14  ;;  %vm395_vm14 = vcmp.eq.f32.partialorder %v394_v23, 8.507059e+37 }
 0x14a   :  { %1173 = vpow2.f32 %v1069_v59  ;;  %vm410_vm3 = vcmp.eq.f32.partialorder %v409_v3, 8.507059e+37 }
 0x14b   :  { %v363_v22 = vsel %vm362_vm5, %v1158_v61, %v359_v43  ;;  %v374_v31 = vadd.f32 %v1162_v2, %v373_v27  ;;  %v397_v61 = vor.u32 1.1754944e-38, %v396_v53 }
 0x14c   :  { %v1644_v20 = vpop.eup %1165  ;;  %v368_v21 = vsel %vm365_vm6, %v367_v28, %v363_v22 }
 0x14d   :  { %v1168_v25 = vpop.eup %1167  ;;  %v386_v26 = vmul.f32 %v1644_v20, %v1637_v1  ;;  %v515_v34 = vsub.f32 1.0, %v368_v21  ;;  %v378_v44 = vsel %vm1658_vm9, %v1162_v2, %v374_v31  ;;  %vm391_vm11 = vweird.f32 %v1644_v20 }
 0x14e   :  { %v1651_v29 = vpop.eup %1169  ;;  %v1653_v24 = vadd.f32 1.0, %v1168_v25  ;;  %v383_v9 = vsel %vm380_vm10, %v382_v46, %v378_v44  ;;  %vm392_vm13 = vmor %vm390_vm12, %vm391_vm11  ;;  %v411_v1 = vand.u32 2147483648, %v1640_v4 }
 0x14f   :  { %v387_v30 = vsub.f32 1.0, %v386_v26  ;;  %v401_v37 = vmul.f32 %v1651_v29, %v1640_v4  ;;  %v1172_v40 = vpop.eup %1171  ;;  %v547_v42 = vmul.f32 %v524_v35, %v515_v34  ;;  %v516_v45 = vsub.f32 1.0, %v383_v9 }
 0x150   :  { %1175 = vrcp.f32 %v1653_v24  ;;  %v1174_v50 = vpop.eup %1173  ;;  %v1667_v7 = vadd.f32 1.0, %v1172_v40  ;;  %vm406_vm15 = vweird.f32 %v1651_v29  ;;  %v412_v33 = vor.u32 1.1754944e-38, %v411_v1 }
 0x151   :  { %v388_v41 = vmul.f32 %v1644_v20, %v387_v30  ;;  %v402_v48 = vsub.f32 1.0, %v401_v37  ;;  %v548_v11 = vmul.f32 %v526_v8, %v516_v45  ;;  %v1681_v60 = vadd.f32 1.0, %v1174_v50  ;;  %vm407_vm2 = vmor %vm405_vm1, %vm406_vm15 }
 0x152   :  { %1177 = vrcp.f32 %v1667_v7  ;;  %vm420_vm4 = vweird.f32 %v1653_v24  ;;  %v426_v35 = vand.u32 2147483648, %v1653_v24  ;;  %v424_v30 = vand.u32 2147483647, %v1653_v24 }
 0x153   :  { %v389_v13 = vadd.f32 %v1644_v20, %v388_v41  ;;  %v403_v10 = vmul.f32 %v1651_v29, %v402_v48  ;;  %1179 = vpow2.f32 %v1070_v52  ;;  %vm435_vm8 = vweird.f32 %v1667_v7 }
 0x154   :  { %1181 = vrcp.f32 %v1681_v60  ;;  %v427_v37 = vor.u32 1.1754944e-38, %v426_v35  ;;  %vm425_vm7 = vcmp.eq.f32.partialorder %v424_v30, 8.507059e+37  ;;  %v439_v44 = vand.u32 2147483647, %v1667_v7 }
 0x155   :  { %v393_v57 = vsel %vm392_vm13, %v1644_v20, %v389_v13  ;;  %v404_v62 = vadd.f32 %v1651_v29, %v403_v10  ;;  %vm450_vm12 = vweird.f32 %v1681_v60  ;;  %v456_v45 = vand.u32 2147483648, %v1681_v60 }
 0x156   :  { %v1671_v51 = vpop.eup %1175  ;;  %v398_v63 = vsel %vm395_vm14, %v397_v61, %v393_v57  ;;  %vm440_vm11 = vcmp.eq.f32.partialorder %v439_v44, 8.507059e+37 }
 0x157   :  { %v416_v16 = vmul.f32 %v1671_v51, %v1653_v24  ;;  %v517_v5 = vsub.f32 1.0, %v398_v63  ;;  %v408_v43 = vsel %vm407_vm2, %v1651_v29, %v404_v62  ;;  %vm421_vm5 = vweird.f32 %v1671_v51 }
 0x158   :  { %v1689_v17 = vpop.eup %1177  ;;  %v413_v15 = vsel %vm410_vm3, %v412_v33, %v408_v43  ;;  %vm1706_vm6 = vmor %vm420_vm4, %vm421_vm5  ;;  %vm570_vm5 = vcmask 254976  }
 0x159   :  { %v417_v54 = vsub.f32 1.0, %v416_v16  ;;  %v1180_v20 = vpop.eup %1179  ;;  %v549_v12 = vmul.f32 %v528_v0, %v517_v5  ;;  %v431_v4 = vmul.f32 %v1689_v17, %v1667_v7  ;;  %v518_v29 = vsub.f32 1.0, %v413_v15 }
 0x15a   :  { %v1698_v22 = vpop.eup %1181  ;;  %v1700_v27 = vadd.f32 1.0, %v1180_v20  ;;  %vm436_vm9 = vweird.f32 %v1689_v17 }
 0x15b   :  { %v418_v14 = vmul.f32 %v1671_v51, %v417_v54  ;;  %v432_v28 = vsub.f32 1.0, %v431_v4  ;;  %v446_v34 = vmul.f32 %v1698_v22, %v1681_v60  ;;  %vm1723_vm10 = vmor %vm435_vm8, %vm436_vm9  ;;  %vm451_vm13 = vweird.f32 %v1698_v22 }
 0x15c   :  { %1183 = vrcp.f32 %v1700_v27  ;;  %vm452_vm14 = vmor %vm450_vm12, %vm451_vm13  ;;  %vm465_vm1 = vweird.f32 %v1700_v27  ;;  %v471_v0 = vand.u32 2147483648, %v1700_v27  ;;  %v469_v20 = vand.u32 2147483647, %v1700_v27 }
 0x15d   :  { %v447_v41 = vsub.f32 1.0, %v446_v34 }
 0x15e   :  { %v472_v4 = vor.u32 1.1754944e-38, %v471_v0  ;;  %vm470_vm4 = vcmp.eq.f32.partialorder %v469_v20, 8.507059e+37 }
 0x162   :  { %v1184_v50 = vpop.eup %1183 }
 0x163   :  { %v461_v23 = vmul.f32 %v1184_v50, %v1700_v27  ;;  %vm466_vm2 = vweird.f32 %v1184_v50 }
 0x164   :  { %vm467_vm3 = vmor %vm465_vm1, %vm466_vm2 }
 0x165   :  { %v462_v62 = vsub.f32 1.0, %v461_v23 }
 0x167   :  { %v463_v3 = vmul.f32 %v1184_v50, %v462_v62 }
 0x181   :  { %v611_v31 = vpop.permute.xlu2 %610 }
 0x182   :  { %v613_v38 = vmul.f32 %v611_v31, %v413_v15 }
 0x18b   :  { %v560_v39 = vpop.permute.xlu1 %559 }
 0x18c   :  { %v562_v55 = vmul.f32 %v560_v39, %v368_v21  ;;  %v419_v21 = vadd.f32 %v1671_v51, %v418_v14  ;;  %v433_v39 = vmul.f32 %v1689_v17, %v432_v28 }
 0x18e   :  { %v563_v49 = vadd.f32 %v562_v55, %v547_v42  ;;  %v423_v24 = vsel %vm1706_vm6, %v1671_v51, %v419_v21  ;;  %v441_v55 = vand.u32 2147483648, %v1667_v7 }
 0x18f   :  { %v428_v46 = vsel %vm425_vm7, %v427_v37, %v423_v24  ;;  %v703_v37 = vld [vmem:[#allocation6 + $0x38] sm:$0xff]  ;;  %v700_v24 = vld [vmem:[#allocation6 + $0x20] sm:$0xff] }
 0x190   :  { %565 = vst [vmem:[#allocation1] ss:$4 sm:$0xff] %v563_v49  ;;  %v434_v49 = vadd.f32 %v1689_v17, %v433_v39  ;;  %v519_v13 = vsub.f32 1.0, %v428_v46  ;;  %v442_v52 = vor.u32 1.1754944e-38, %v441_v55  ;;  %745 = vmatpush.msra.mxu1 %v703_v37  ;;  %1086 = vmatpush.msra.mxu3 %v703_v37  ;;  %v701_v39 = vld [vmem:[#allocation6 + $0x28] sm:$0xff] }
 0x191   :  { %v1103_v55 = vld [vmem:[#allocation8 + $0x2] ss:$0 sm:$0xff] }
 0x192   :  { %v438_v7 = vsel %vm1723_vm10, %v1689_v17, %v434_v49 }
 0x193   :  { %v577_v56 = vpop.permute.xlu1 %576 }
 0x194   :  { %v579_v58 = vmul.f32 %v577_v56, %v383_v9  ;;  %v448_v9 = vmul.f32 %v1698_v22, %v447_v41  ;;  %v454_v56 = vand.u32 2147483647, %v1681_v60 }
 0x195   :  { %v594_v2 = vpop.permute.xlu0 %593 }
 0x196   :  { %v580_v18 = vadd.f32 %v579_v58, %v548_v11  ;;  %v596_v6 = vmul.f32 %v594_v2, %v398_v63  ;;  %v449_v10 = vadd.f32 %v1698_v22, %v448_v9  ;;  %v443_v11 = vsel %vm440_vm11, %v442_v52, %v438_v7  ;;  %v534_v58 = vpop.permute.xlu2 %533 }
 0x197   :  { %v566_v19 = vld.sshfl [vmem:[#allocation1] sm:$0xff pattern:$0x73625140]  ;;  %v520_v63 = vsub.f32 1.0, %v443_v11  ;;  %vm455_vm15 = vcmp.eq.f32.partialorder %v454_v56, 8.507059e+37 }
 0x198   :  { %582 = vst [vmem:[#allocation1] ss:$4 sm:$0xff] %v580_v18  ;;  %567 = vrot.lane.b32.xlu2 %v566_v19, %s1334_s2  ;;  %v597_v26 = vadd.f32 %v596_v6, %v549_v12  ;;  %v457_v18 = vor.u32 1.1754944e-38, %v456_v45  ;;  %v453_v1 = vsel %vm452_vm14, %v1698_v22, %v449_v10  ;;  %v464_v6 = vadd.f32 %v1184_v50, %v463_v3 }
 0x199   :  { %v552_v2 = vmul.f32 %v534_v58, %v520_v63 }
 0x19a   :  { %v458_v54 = vsel %vm455_vm15, %v457_v18, %v453_v1  ;;  %v468_v15 = vsel %vm467_vm3, %v1184_v50, %v464_v6 }
 0x19b   :  { %v530_v25 = vpop.permute.xlu1 %529  ;;  %v521_v43 = vsub.f32 1.0, %v458_v54 }
 0x19c   :  { %v550_v36 = vmul.f32 %v530_v25, %v518_v29 }
 0x19d   :  { %v532_v40 = vpop.permute.xlu0 %531 }
 0x19e   :  { %v614_v42 = vadd.f32 %v613_v38, %v550_v36  ;;  %v551_v53 = vmul.f32 %v532_v40, %v519_v13  ;;  %v662_v33 = vpop.permute.xlu2 %661  ;;  %v702_v38 = vld [vmem:[#allocation6 + $0x30] sm:$0xff] }
 0x19f   :  { %v583_v59 = vld.sshfl [vmem:[#allocation1] sm:$0xff pattern:$0x73625140]  ;;  %v664_v14 = vmul.f32 %v662_v33, %v458_v54  ;;  %746 = vmatpush.msra.mxu1 %v702_v38  ;;  %1087 = vmatpush.msra.mxu3 %v702_v38 }
 0x1a0   :  { %599 = vst [vmem:[#allocation1] ss:$4 sm:$0xff] %v597_v26  ;;  %584 = vrot.lane.b32.xlu0 %v583_v59, %s1334_s2  ;;  %v473_v26 = vsel %vm470_vm4, %v472_v4, %v468_v15 }
 0x1a1   :  { %v522_v28 = vsub.f32 1.0, %v473_v26  ;;  %747 = vmatpush.msra.mxu1 %v701_v39  ;;  %1088 = vmatpush.msra.mxu3 %v701_v39 }
 0x1a3   :  { %v628_v48 = vpop.permute.xlu1 %627  ;;  %748 = vmatpush.msra.mxu1 %v700_v24  ;;  %1089 = vmatpush.msra.mxu3 %v700_v24 }
 0x1a4   :  { %v630_v51 = vmul.f32 %v628_v48, %v428_v46 }
 0x1a5   :  { %v645_v16 = vpop.permute.xlu0 %644 }
 0x1a6   :  { %v631_v57 = vadd.f32 %v630_v51, %v551_v53  ;;  %v647_v19 = vmul.f32 %v645_v16, %v443_v11 }
 0x1a7   :  { %v600_v47 = vld.sshfl [vmem:[#allocation1] sm:$0xff pattern:$0x73625140] }
 0x1a8   :  { %616 = vst [vmem:[#allocation1] ss:$4 sm:$0xff] %v614_v42  ;;  %601 = vrot.lane.b32.xlu1 %v600_v47, %s1334_s2  ;;  %v648_v17 = vadd.f32 %v647_v19, %v552_v2  ;;  %v1104_v19 = vld [vmem:[#allocation8 + $0x3] ss:$0 sm:$0xff] }
 0x1ab   :  { %v536_v60 = vpop.permute.xlu1 %535 }
 0x1ac   :  { %v553_v12 = vmul.f32 %v536_v60, %v521_v43 }
 0x1ad   :  { %v538_v35 = vpop.permute.xlu0 %537 }
 0x1ae   :  { %v665_v25 = vadd.f32 %v664_v14, %v553_v12  ;;  %v554_v29 = vmul.f32 %v538_v35, %v522_v28 }
 0x1af   :  { %v617_v61 = vld.sshfl [vmem:[#allocation1] sm:$0xff pattern:$0x73625140] }
 0x1b0   :  { %618 = vrot.lane.b32.xlu2 %v617_v61, %s1334_s2  ;;  %633 = vst [vmem:[#allocation1] ss:$4 sm:$0xff] %v631_v57 }
 0x1b3   :  { %v679_v22 = vpop.permute.xlu1 %678 }
 0x1b4   :  { %v681_v27 = vmul.f32 %v679_v22, %v473_v26 }
 0x1b6   :  { %v682_v21 = vadd.f32 %v681_v27, %v554_v29 }
 0x1b7   :  { %v634_v5 = vld.sshfl [vmem:[#allocation1] sm:$0xff pattern:$0x73625140] }
 0x1b8   :  { %635 = vrot.lane.b32.xlu0 %v634_v5, %s1334_s2  ;;  %650 = vst [vmem:[#allocation1] ss:$4 sm:$0xff] %v648_v17 }
 0x1bf   :  { %v651_v59 = vld.sshfl [vmem:[#allocation1] sm:$0xff pattern:$0x73625140] }
 0x1c0   :  { %652 = vrot.lane.b32.xlu1 %v651_v59, %s1334_s2  ;;  %667 = vst [vmem:[#allocation1] ss:$4 sm:$0xff] %v665_v25 }
 0x1c7   :  { %v668_v30 = vld.sshfl [vmem:[#allocation1] sm:$0xff pattern:$0x73625140] }
 0x1c8   :  { %669 = vrot.lane.b32.xlu2 %v668_v30, %s1334_s2  ;;  %684 = vst [vmem:[#allocation1] ss:$4 sm:$0xff] %v682_v21  ;;  %772 = vrot.lane.b32.xlu1 %v1103_v55, %s1329_s24 }
 0x1cf   :  { %v685_v31 = vld.sshfl [vmem:[#allocation1] sm:$0xff pattern:$0x73625140] }
 0x1d0   :  { %686 = vrot.lane.b32.xlu0 %v685_v31, %s1334_s2 }
 0x1f2   :  { %v568_v32 = vpop.permute.xlu2 %567 }
 0x1f3   :  { %571 = vst.msk [vmem:[#allocation2] sm:$0x3] %vm570_vm5, %v568_v32 }
 0x1fa   :  { %v691_v34 = vld [vmem:[#allocation2] sm:$0x3] }
 0x1fb   :  { %712 = vst [vmem:[#allocation1] ss:$4 sm:$0xff] %v691_v34 }
 0x20a   :  { %v619_v36 = vpop.permute.xlu2 %618 }
 0x20b   :  { %622 = vst.msk [vmem:[#allocation2 + $0x6] sm:$0x3] %vm570_vm5, %v619_v36 }
 0x212   :  { %v694_v40 = vld [vmem:[#allocation2 + $0x6] sm:$0x3]  ;;  %v585_v41 = vpop.permute.xlu0 %584 }
 0x213   :  { %718 = vst [vmem:[#allocation1 + $0x3] ss:$4 sm:$0xff] %v694_v40 }
 0x214   :  { %588 = vst.msk [vmem:[#allocation2 + $0x2] sm:$0x3] %vm570_vm5, %v585_v41 }
 0x21a   :  { %v602_v42 = vpop.permute.xlu1 %601 }
 0x21b   :  { %v692_v44 = vld [vmem:[#allocation2 + $0x2] sm:$0x3]  ;;  %605 = vst.msk [vmem:[#allocation2 + $0x4] sm:$0x3] %vm570_vm5, %v602_v42 }
 0x21c   :  { %714 = vst [vmem:[#allocation1 + $0x1] ss:$4 sm:$0xff] %v692_v44 }
 0x222   :  { %v693_v47 = vld [vmem:[#allocation2 + $0x4] sm:$0x3]  ;;  %v670_v46 = vpop.permute.xlu2 %669 }
 0x223   :  { %716 = vst [vmem:[#allocation1 + $0x2] ss:$4 sm:$0xff] %v693_v47 }
 0x224   :  { %673 = vst.msk [vmem:[#allocation2 + $0xc] sm:$0x3] %vm570_vm5, %v670_v46 }
 0x22a   :  { %v636_v48 = vpop.permute.xlu0 %635  ;;  %v727_v49 = vld.sshfl [vmem:[#allocation1] sm:$0xff pattern:$0x73625140] }
 0x22b   :  { %v697_v50 = vld [vmem:[#allocation2 + $0xc] sm:$0x3]  ;;  %639 = vst.msk [vmem:[#allocation2 + $0x8] sm:$0x3] %vm570_vm5, %v636_v48  ;;  %1071 = vmatmul.msk.f32.vlgmr.msra.gmra.mxu1 %vm103_vm0, %v727_v49 }
 0x22c   :  { %724 = vst [vmem:[#allocation1 + $0x22] ss:$4 sm:$0xff] %v697_v50 }
 0x232   :  { %v695_v8 = vld [vmem:[#allocation2 + $0x8] sm:$0x3]  ;;  %v653_v9 = vpop.permute.xlu1 %652 }
 0x233   :  { %720 = vst [vmem:[#allocation1 + $0x20] ss:$4 sm:$0xff] %v695_v8 }
 0x234   :  { %656 = vst.msk [vmem:[#allocation2 + $0xa] sm:$0x3] %vm570_vm5, %v653_v9 }
 0x23a   :  { %v1761_v56 = vpop.permute.xlu1 %772 }
 0x23b   :  { %v696_v13 = vld [vmem:[#allocation2 + $0xa] sm:$0x3] }
 0x23c   :  { %722 = vst [vmem:[#allocation1 + $0x21] ss:$4 sm:$0xff] %v696_v13 }
 0x242   :  { %v687_v51 = vpop.permute.xlu0 %686 }
 0x243   :  { %690 = vst.msk [vmem:[#allocation2 + $0xe] sm:$0x3] %vm570_vm5, %v687_v51 }
 0x24a   :  { %v698_v52 = vld [vmem:[#allocation2 + $0xe] sm:$0x3] }
 0x24b   :  { %726 = vst [vmem:[#allocation1 + $0x23] ss:$4 sm:$0xff] %v698_v52 }
 0x252   :  { %v728_v7 = vld.sshfl [vmem:[#allocation1 + $0x20] sm:$0xff pattern:$0x73625140] }
 0x253   :  { %1072 = vmatmul.msk.f32.vlgmr.msra.gmra.mxu3 %vm103_vm0, %v728_v7 }
 0x2a8   :  { %v750_v53 = vpop.f32.mrf.mxu1 }
 0x2a9   :  { %968 = vrot.lane.b32.xlu2 %v750_v53, %s1329_s24  ;;  %v759_v23 = vrot.slane %v750_v53, 4  ;;  %v758_v45 = vrot.slane %v750_v53, 2  ;;  %v760_v10 = vrot.slane %v750_v53, 6  ;;  %v775_v57 = vadd.f32 %v1761_v56, %v750_v53 }
 0x2ab   :  { %972 = vrot.lane.b32.xlu1 %v759_v23, %s1329_s24  ;;  %970 = vrot.lane.b32.xlu0 %v758_v45, %s1329_s24  ;;  %v1073_v11 = vmul.f32 -1.442695, %v775_v57  ;;  %v776_v58 = vadd.f32 %v1761_v56, %v758_v45  ;;  %v777_v17 = vadd.f32 %v1761_v56, %v759_v23  ;;  %v778_v43 = vadd.f32 %v1761_v56, %v760_v10 }
 0x2ad   :  { %1185 = vpow2.f32 %v1073_v11  ;;  %v1074_v18 = vmul.f32 -1.442695, %v776_v58  ;;  %v1075_v5 = vmul.f32 -1.442695, %v777_v17  ;;  %v1076_v33 = vmul.f32 -1.442695, %v778_v43 }
 0x2af   :  { %1187 = vpow2.f32 %v1074_v18 }
 0x2b1   :  { %974 = vrot.lane.b32.xlu2 %v760_v10, %s1329_s24 }
 0x2b3   :  { %v1186_v63 = vpop.eup %1185 }
 0x2b4   :  { %v807_v2 = vadd.f32 1.0, %v1186_v63 }
 0x2b5   :  { %v1188_v3 = vpop.eup %1187 }
 0x2b6   :  { %1189 = vrcp.f32 %v807_v2  ;;  %v808_v54 = vadd.f32 1.0, %v1188_v3  ;;  %v826_v26 = vand.u32 2147483648, %v807_v2  ;;  %vm820_vm6 = vweird.f32 %v807_v2 }
 0x2b7   :  { %v824_v59 = vand.u32 2147483647, %v807_v2 }
 0x2b8   :  { %1191 = vrcp.f32 %v808_v54  ;;  %v827_v29 = vor.u32 1.1754944e-38, %v826_v26  ;;  %v841_v36 = vand.u32 2147483648, %v808_v54  ;;  %vm835_vm10 = vweird.f32 %v808_v54 }
 0x2b9   :  { %1193 = vpow2.f32 %v1075_v5  ;;  %vm825_vm8 = vcmp.eq.f32.partialorder %v824_v59, 8.507059e+37  ;;  %v839_v38 = vand.u32 2147483647, %v808_v54 }
 0x2ba   :  { %1195 = vpow2.f32 %v1076_v33  ;;  %v842_v42 = vor.u32 1.1754944e-38, %v841_v36 }
 0x2bb   :  { %vm840_vm12 = vcmp.eq.f32.partialorder %v839_v38, 8.507059e+37 }
 0x2bc   :  { %v1190_v60 = vpop.eup %1189 }
 0x2bd   :  { %v816_v0 = vmul.f32 %v1190_v60, %v807_v2  ;;  %vm821_vm0 = vweird.f32 %v1190_v60 }
 0x2be   :  { %v1192_v20 = vpop.eup %1191  ;;  %vm822_vm7 = vmor %vm820_vm6, %vm821_vm0 }
 0x2bf   :  { %v817_v6 = vsub.f32 1.0, %v816_v0  ;;  %v831_v4 = vmul.f32 %v1192_v20, %v808_v54  ;;  %v1194_v25 = vpop.eup %1193  ;;  %vm836_vm9 = vweird.f32 %v1192_v20 }
 0x2c0   :  { %v809_v35 = vadd.f32 1.0, %v1194_v25  ;;  %v1196_v21 = vpop.eup %1195  ;;  %vm837_vm11 = vmor %vm835_vm10, %vm836_vm9 }
 0x2c1   :  { %v818_v12 = vmul.f32 %v1190_v60, %v817_v6  ;;  %v832_v15 = vsub.f32 1.0, %v831_v4  ;;  %v810_v34 = vadd.f32 1.0, %v1196_v21 }
 0x2c2   :  { %1197 = vrcp.f32 %v809_v35  ;;  %v856_v23 = vand.u32 2147483648, %v809_v35  ;;  %vm850_vm14 = vweird.f32 %v809_v35  ;;  %v854_v10 = vand.u32 2147483647, %v809_v35 }
 0x2c3   :  { %v819_v14 = vadd.f32 %v1190_v60, %v818_v12  ;;  %v833_v27 = vmul.f32 %v1192_v20, %v832_v15  ;;  %vm865_vm3 = vweird.f32 %v810_v34  ;;  %v871_v17 = vand.u32 2147483648, %v810_v34 }
 0x2c4   :  { %v857_v18 = vor.u32 1.1754944e-38, %v856_v23  ;;  %vm855_vm2 = vcmp.eq.f32.partialorder %v854_v10, 8.507059e+37  ;;  %v869_v5 = vand.u32 2147483647, %v810_v34 }
 0x2c5   :  { %v823_v28 = vsel %vm822_vm7, %v1190_v60, %v819_v14  ;;  %v834_v32 = vadd.f32 %v1192_v20, %v833_v27  ;;  %v872_v14 = vor.u32 1.1754944e-38, %v871_v17 }
 0x2c6   :  { %v828_v31 = vsel %vm825_vm8, %v827_v29, %v823_v28  ;;  %vm870_vm0 = vcmp.eq.f32.partialorder %v869_v5, 8.507059e+37 }
 0x2c7   :  { %v960_v37 = vsub.f32 1.0, %v828_v31  ;;  %v1000_v40 = vmul.f32 0.0, %v828_v31  ;;  %v838_v41 = vsel %vm837_vm11, %v1192_v20, %v834_v32 }
 0x2c8   :  { %v1198_v44 = vpop.eup %1197  ;;  %v843_v47 = vsel %vm840_vm12, %v842_v42, %v838_v41 }
 0x2c9   :  { %v846_v49 = vmul.f32 %v1198_v44, %v809_v35  ;;  %vm851_vm13 = vweird.f32 %v1198_v44 }
 0x2ca   :  { %vm852_vm15 = vmor %vm850_vm14, %vm851_vm13 }
 0x2cb   :  { %v847_v9 = vsub.f32 1.0, %v846_v49 }
 0x2cd   :  { %v848_v51 = vmul.f32 %v1198_v44, %v847_v9 }
 0x2cf   :  { %v849_v53 = vadd.f32 %v1198_v44, %v848_v51 }
 0x2d1   :  { %v853_v58 = vsel %vm852_vm15, %v1198_v44, %v849_v53 }
 0x2d2   :  { %v858_v54 = vsel %vm855_vm2, %v857_v18, %v853_v58 }
 0x2d3   :  { %v962_v20 = vsub.f32 1.0, %v858_v54 }
 0x2d6   :  { %v1765_v16 = vpop.f32.mrf.mxu3 }
 0x2d7   :  { %976 = vrot.lane.b32.xlu0 %v1765_v16, %s1329_s24  ;;  %v762_v61 = vrot.slane %v1765_v16, 4  ;;  %v761_v62 = vrot.slane %v1765_v16, 2  ;;  %v1778_v1 = vrot.slane %v1765_v16, 6  ;;  %v779_v22 = vadd.f32 %v1761_v56, %v1765_v16 }
 0x2d9   :  { %980 = vrot.lane.b32.xlu2 %v762_v61, %s1329_s24  ;;  %978 = vrot.lane.b32.xlu1 %v761_v62, %s1329_s24  ;;  %v1077_v30 = vmul.f32 -1.442695, %v779_v22  ;;  %v780_v57 = vadd.f32 %v1761_v56, %v761_v62  ;;  %v781_v2 = vadd.f32 %v1761_v56, %v762_v61  ;;  %v782_v6 = vadd.f32 %v1761_v56, %v1778_v1 }
 0x2db   :  { %1199 = vpow2.f32 %v1077_v30  ;;  %v1078_v3 = vmul.f32 -1.442695, %v780_v57  ;;  %v1079_v33 = vmul.f32 -1.442695, %v781_v2  ;;  %v1080_v26 = vmul.f32 -1.442695, %v782_v6 }
 0x2dc   :  { %1201 = vrcp.f32 %v810_v34 }
 0x2df   :  { %982 = vrot.lane.b32.xlu0 %v1778_v1, %s1329_s24 }
 0x2e1   :  { %937 = vrot.lane.b32.xlu1 %v1104_v19, %s1334_s2  ;;  %v1200_v46 = vpop.eup %1199  ;;  %v961_v19 = vsub.f32 1.0, %v843_v47 }
 0x2e2   :  { %v1788_v50 = vadd.f32 1.0, %v1200_v46  ;;  %v1202_v8 = vpop.eup %1201 }
 0x2e3   :  { %v861_v13 = vmul.f32 %v1202_v8, %v810_v34  ;;  %vm866_vm1 = vweird.f32 %v1202_v8 }
 0x2e4   :  { %1203 = vrcp.f32 %v1788_v50  ;;  %vm1798_vm4 = vmor %vm865_vm3, %vm866_vm1  ;;  %v886_v28 = vand.u32 2147483648, %v1788_v50  ;;  %vm880_vm7 = vweird.f32 %v1788_v50  ;;  %v884_v30 = vand.u32 2147483647, %v1788_v50 }
 0x2e5   :  { %1205 = vpow2.f32 %v1078_v3 }
 0x2e6   :  { %1207 = vpow2.f32 %v1079_v33  ;;  %v887_v36 = vor.u32 1.1754944e-38, %v886_v28  ;;  %vm885_vm9 = vcmp.eq.f32.partialorder %v884_v30, 8.507059e+37 }
 0x2e7   :  { %1023 = vrot.lane.b32.xlu0 %v698_v52, %s1334_s2  ;;  %v862_v52 = vsub.f32 1.0, %v861_v13  ;;  %1209 = vpow2.f32 %v1080_v26 }
 0x2e9   :  { %v863_v45 = vmul.f32 %v1202_v8, %v862_v52 }
 0x2ea   :  { %v1204_v7 = vpop.eup %1203 }
 0x2eb   :  { %v876_v11 = vmul.f32 %v1204_v7, %v1788_v50  ;;  %v864_v63 = vadd.f32 %v1202_v8, %v863_v45  ;;  %vm881_vm6 = vweird.f32 %v1204_v7  ;;  %v1206_v27 = vpop.eup %1205 }
 0x2ec   :  { %vm882_vm8 = vmor %vm880_vm7, %vm881_vm6  ;;  %v812_v34 = vadd.f32 1.0, %v1206_v27 }
 0x2ed   :  { %v877_v60 = vsub.f32 1.0, %v876_v11  ;;  %v868_v16 = vsel %vm1798_vm4, %v1202_v8, %v864_v63 }
 0x2ee   :  { %v873_v22 = vsel %vm870_vm0, %v872_v14, %v868_v16  ;;  %1211 = vrcp.f32 %v812_v34  ;;  %vm895_vm11 = vweird.f32 %v812_v34  ;;  %v899_v53 = vand.u32 2147483647, %v812_v34 }
 0x2ef   :  { %v878_v4 = vmul.f32 %v1204_v7, %v877_v60  ;;  %v963_v29 = vsub.f32 1.0, %v873_v22 }
 0x2f0   :  { %vm900_vm15 = vcmp.eq.f32.partialorder %v899_v53, 8.507059e+37 }
 0x2f1   :  { %v879_v35 = vadd.f32 %v1204_v7, %v878_v4 }
 0x2f3   :  { %v883_v32 = vsel %vm882_vm8, %v1204_v7, %v879_v35  ;;  %v901_v7 = vand.u32 2147483648, %v812_v34 }
 0x2f5   :  { %v902_v58 = vor.u32 1.1754944e-38, %v901_v7 }
 0x303   :  { %v969_v39 = vpop.permute.xlu2 %968 }
 0x304   :  { %v992_v24 = vmul.f32 %v969_v39, %v960_v37  ;;  %v1208_v37 = vpop.eup %1207  ;;  %v888_v39 = vsel %vm885_vm9, %v887_v36, %v883_v32 }
 0x305   :  { %v1210_v41 = vpop.eup %1209  ;;  %v964_v18 = vsub.f32 1.0, %v888_v39 }
 0x306   :  { %v1001_v55 = vadd.f32 %v1000_v40, %v992_v24  ;;  %v813_v40 = vadd.f32 1.0, %v1208_v37  ;;  %v814_v42 = vadd.f32 1.0, %v1210_v41  ;;  %v1212_v44 = vpop.eup %1211 }
 0x307   :  { %vm896_vm10 = vweird.f32 %v1212_v44 }
 0x308   :  { %v1002_v48 = vmul.f32 %v1001_v55, %v843_v47  ;;  %1213 = vrcp.f32 %v813_v40  ;;  %v891_v55 = vmul.f32 %v1212_v44, %v812_v34  ;;  %vm897_vm12 = vmor %vm895_vm11, %vm896_vm10  ;;  %v914_v57 = vand.u32 2147483647, %v813_v40 }
 0x309   :  { %1215 = vrcp.f32 %v814_v42  ;;  %v916_v11 = vand.u32 2147483648, %v813_v40  ;;  %vm910_vm14 = vweird.f32 %v813_v40  ;;  %v931_v62 = vand.u32 2147483648, %v814_v42 }
 0x30a   :  { %vm915_vm3 = vcmp.eq.f32.partialorder %v914_v57, 8.507059e+37  ;;  %vm925_vm4 = vweird.f32 %v814_v42  ;;  %v929_v6 = vand.u32 2147483647, %v814_v42 }
 0x30b   :  { %v975_v56 = vpop.permute.xlu2 %974  ;;  %v917_v17 = vor.u32 1.1754944e-38, %v916_v11  ;;  %v932_v4 = vor.u32 1.1754944e-38, %v931_v62 }
 0x30c   :  { %v995_v31 = vmul.f32 %v975_v56, %v963_v29  ;;  %vm930_vm6 = vcmp.eq.f32.partialorder %v929_v6, 8.507059e+37 }
 0x30e   :  { %v1214_v47 = vpop.eup %1213 }
 0x30f   :  { %v906_v46 = vmul.f32 %v1214_v47, %v813_v40  ;;  %v1216_v49 = vpop.eup %1215  ;;  %vm911_vm13 = vweird.f32 %v1214_v47 }
 0x310   :  { %v921_v9 = vmul.f32 %v1216_v49, %v814_v42  ;;  %vm1809_vm1 = vmor %vm910_vm14, %vm911_vm13  ;;  %vm926_vm2 = vweird.f32 %v1216_v49 }
 0x311   :  { %v907_v50 = vsub.f32 1.0, %v906_v46  ;;  %vm927_vm0 = vmor %vm925_vm4, %vm926_vm2 }
 0x312   :  { %v922_v52 = vsub.f32 1.0, %v921_v9 }
 0x313   :  { %v908_v13 = vmul.f32 %v1214_v47, %v907_v50 }
 0x314   :  { %v923_v10 = vmul.f32 %v1216_v49, %v922_v52 }
 0x315   :  { %v909_v23 = vadd.f32 %v1214_v47, %v908_v13 }
 0x316   :  { %v924_v60 = vadd.f32 %v1216_v49, %v923_v10 }
 0x317   :  { %v913_v3 = vsel %vm1809_vm1, %v1214_v47, %v909_v23 }
 0x318   :  { %v918_v16 = vsel %vm915_vm3, %v917_v17, %v913_v3  ;;  %v928_v33 = vsel %vm927_vm0, %v1216_v49, %v924_v60 }
 0x319   :  { %v966_v14 = vsub.f32 1.0, %v918_v16 }
 0x31d   :  { %v971_v0 = vpop.permute.xlu0 %970  ;;  %v973_v61 = vpop.permute.xlu1 %972 }
 0x31e   :  { %v993_v43 = vmul.f32 %v971_v0, %v961_v19  ;;  %v994_v25 = vmul.f32 %v973_v61, %v962_v20 }
 0x320   :  { %v1003_v12 = vadd.f32 %v1002_v48, %v993_v43  ;;  %v892_v48 = vsub.f32 1.0, %v891_v55 }
 0x322   :  { %v1004_v15 = vmul.f32 %v1003_v12, %v858_v54  ;;  %v893_v8 = vmul.f32 %v1212_v44, %v892_v48 }
 0x324   :  { %v1005_v59 = vadd.f32 %v1004_v15, %v994_v25  ;;  %v894_v51 = vadd.f32 %v1212_v44, %v893_v8  ;;  %v933_v25 = vsel %vm930_vm6, %v932_v4, %v928_v33 }
 0x325   :  { %v967_v35 = vsub.f32 1.0, %v933_v25 }
 0x326   :  { %v1006_v21 = vmul.f32 %v1005_v59, %v873_v22  ;;  %v898_v45 = vsel %vm897_vm12, %v1212_v44, %v894_v51 }
 0x327   :  { %v903_v2 = vsel %vm900_vm15, %v902_v58, %v898_v45 }
 0x328   :  { %v1007_v38 = vadd.f32 %v1006_v21, %v995_v31  ;;  %v965_v43 = vsub.f32 1.0, %v903_v2 }
 0x32a   :  { %v1008_v24 = vmul.f32 %v1007_v38, %v888_v39 }
 0x333   :  { %v981_v12 = vpop.permute.xlu2 %980 }
 0x334   :  { %v998_v26 = vmul.f32 %v981_v12, %v966_v14 }
 0x349   :  { %v977_v19 = vpop.permute.xlu0 %976 }
 0x34a   :  { %v996_v54 = vmul.f32 %v977_v19, %v964_v18 }
 0x34b   :  { %v979_v0 = vpop.permute.xlu1 %978 }
 0x34c   :  { %v1009_v5 = vadd.f32 %v1008_v24, %v996_v54  ;;  %v997_v61 = vmul.f32 %v979_v0, %v965_v43 }
 0x34e   :  { %v1010_v20 = vmul.f32 %v1009_v5, %v903_v2 }
 0x350   :  { %v1011_v15 = vadd.f32 %v1010_v20, %v997_v61 }
 0x351   :  { %v983_v59 = vpop.permute.xlu0 %982 }
 0x352   :  { %v1012_v22 = vmul.f32 %v1011_v15, %v918_v16  ;;  %v999_v28 = vmul.f32 %v983_v59, %v967_v35 }
 0x353   :  { %v938_v30 = vpop.permute.xlu1 %937 }
 0x354   :  { %v1013_v56 = vadd.f32 %v1012_v22, %v998_v26  ;;  %v940_v31 = vadd.f32 %v938_v30, %v1778_v1 }
 0x356   :  { %v1014_v27 = vmul.f32 %v1013_v56, %v933_v25  ;;  %v1081_v32 = vmul.f32 -1.442695, %v940_v31 }
 0x358   :  { %v1015_v29 = vadd.f32 %v1014_v27, %v999_v28 }
 0x359   :  { %v1024_v46 = vpop.permute.xlu0 %1023 }
 0x35a   :  { %1217 = vtanh.f32 %v1015_v29 }
 0x35b   :  { %1219 = vpow2.f32 %v1081_v32 }
 0x360   :  { %v1218_v21 = vpop.eup %1217 }
 0x361   :  { %1018 = vrot.lane.b32.xlu2 %v1218_v21, %s1329_s24  ;;  %v1220_v34 = vpop.eup %1219 }
 0x362   :  { %v944_v36 = vadd.f32 1.0, %v1220_v34 }
 0x364   :  { %1221 = vrcp.f32 %v944_v36  ;;  %v956_v41 = vand.u32 2147483648, %v944_v36  ;;  %vm950_vm8 = vweird.f32 %v944_v36  ;;  %v954_v42 = vand.u32 2147483647, %v944_v36 }
 0x366   :  { %v957_v55 = vor.u32 1.1754944e-38, %v956_v41  ;;  %vm955_vm10 = vcmp.eq.f32.partialorder %v954_v42, 8.507059e+37 }
 0x36a   :  { %v1222_v37 = vpop.eup %1221 }
 0x36b   :  { %v946_v38 = vmul.f32 %v1222_v37, %v944_v36  ;;  %vm951_vm7 = vweird.f32 %v1222_v37 }
 0x36c   :  { %vm952_vm9 = vmor %vm950_vm8, %vm951_vm7 }
 0x36d   :  { %v947_v39 = vsub.f32 1.0, %v946_v38 }
 0x36f   :  { %v948_v24 = vmul.f32 %v1222_v37, %v947_v39 }
 0x371   :  { %v949_v40 = vadd.f32 %v1222_v37, %v948_v24 }
 0x373   :  { %v953_v44 = vsel %vm952_vm9, %v1222_v37, %v949_v40 }
 0x374   :  { %v958_v47 = vsel %vm955_vm10, %v957_v55, %v953_v44 }
 0x375   :  { %v1022_v1 = vsub.f32 1.0, %v958_v47 }
 0x377   :  { %v1026_v49 = vmul.f32 %v1024_v46, %v1022_v1 }
 0x3bb   :  { %v1019_v48 = vpop.permute.xlu2 %1018 }
 0x3bc   :  { %v1021_v50 = vmul.f32 %v1019_v48, %v958_v47 }
 0x3be   :  { %v1027_v8 = vadd.f32 %v1026_v49, %v1021_v50 }
 0x3c0   :  { %1029 = vst [vmem:[#allocation1] ss:$4 sm:$0xff] %v1027_v8 }
 0x3c7   :  { %v1030_v9 = vld.sshfl [vmem:[#allocation1] sm:$0xff pattern:$0x73625140] }
 0x3c8   :  { %1031 = vrot.lane.b32.xlu1 %v1030_v9, %s1334_s2 }
 0x43a   :  { %v1032_v13 = vpop.permute.xlu1 %1031 }
 0x43b   :  { %1034 = vst.msk [vmem:[#allocation9] sm:$0x3] %vm570_vm5, %v1032_v13 }
 0x43c   :  { %1045 = dma.vmem_to_hbm [thread:$0]  %s1041_s5, 32, %s1043_s8, [#allocation5]  }
 0x43d   :  { %1323 = dma.done.wait [#allocation5], 32  }
 0x43e   :  { %1324 = vsyncadd [#allocation5], 4294967264 }
 0x43f   :  { %1050 = vsyncpa [#allocation4], 1 }
 0x440   :  { %1051 = vsyncpa [#allocation7], 1 }
 0x441   :  { %1052 = vsyncpa [#allocation5], 1 }

</bundles_post_ra>
